<compile_context>
chip_gen: v5e
topology: v5e:2x2
jax: 0.10.0
libtpu: 0.0.40
codegen_flags: <defaults>
</compile_context>

<pallas_src>
import jax
import jax.numpy as jnp
from jax.experimental import pallas as pl
from jax.experimental.pallas import tpu as pltpu

EPS = 1e-12
PRELU_ALPHA = 0.25            # nn.PReLU() default (single shared parameter)


# ---------------------------------------------------------------------------
# small helpers
# ---------------------------------------------------------------------------
def _cdiv(a, b):
    return -(-a // b)


def _round_up(x, m):
    return _cdiv(x, m) * m


def _vmem_budget():
    """Per-generation VMEM budget: <= ~48 MiB on v7x, larger on v5e/v6e."""
    cap = 64 * 1024 * 1024
    try:
        info_fn = getattr(pltpu, "get_tpu_info", None)
        if info_fn is not None:
            cap = int(getattr(info_fn(), "vmem_capacity_bytes", cap))
    except Exception:
        pass
    return min(100 * 1024 * 1024, (cap * 3) // 4)


_VMEM_LIMIT = _vmem_budget()
_TM_MAX = 2048 if _VMEM_LIMIT >= 64 * 1024 * 1024 else 1024


def _prelu(x):
    return jnp.where(x > 0, x, PRELU_ALPHA * x)


def _resident(shape):
    """Full-extent block, constant index_map -> stays resident in VMEM."""
    # TODO(synk): pipeline_mode=pl.Buffered(1) would single-buffer these small
    # resident weights; left at the default for portability across jax versions.
    return pl.BlockSpec(shape, lambda i: (0,) * len(shape))


def _pick_tm(M, bytes_per_row):
    """Even-ish row tiles (no near-doubling), capped by the VMEM budget."""
    cap = _VMEM_LIMIT // max(bytes_per_row, 1)
    tm_max = max(8, min(_TM_MAX, (cap // 8) * 8))
    n_tiles = max(1, _cdiv(M, tm_max))
    return _round_up(_cdiv(M, n_tiles), 8)


# ---------------------------------------------------------------------------
# generic row-tiled pallas_call (fully 'parallel', weights resident)
# ---------------------------------------------------------------------------
def _row_call(kernel, row_inputs, consts, out_cols, *, live_cols=0):
    """Run kernel(row_tiles..., const_refs..., o_tile) tiled over shared rows.

    row_inputs: list of (M, Ci) float32 arrays tiled along rows (same M).
    consts:     small arrays kept resident in VMEM (weights / biases).
    live_cols:  rough per-row width of in-kernel intermediates (VMEM sizing).
    """
    M = row_inputs[0].shape[0]
    cin = sum(a.shape[1] for a in row_inputs)
    bytes_per_row = 4 * (2 * (cin + out_cols) + live_cols)   # double-buffered i/o
    tm = _pick_tm(M, bytes_per_row)
    Mp = _round_up(M, tm)
    if Mp != M:
        row_inputs = [jnp.pad(a, ((0, Mp - M), (0, 0))) for a in row_inputs]
    in_specs = [pl.BlockSpec((tm, a.shape[1]), lambda i: (i, 0)) for a in row_inputs]
    in_specs += [_resident(c.shape) for c in consts]
    out = pl.pallas_call(
        kernel,
        out_shape=jax.ShapeDtypeStruct((Mp, out_cols), jnp.float32),
        grid=(Mp // tm,),
        in_specs=in_specs,
        out_specs=pl.BlockSpec((tm, out_cols), lambda i: (i, 0)),
        compiler_params=pltpu.CompilerParams(
            dimension_semantics=("parallel",),
            vmem_limit_bytes=_VMEM_LIMIT),
    )(*row_inputs, *consts)
    return out[:M] if Mp != M else out


# ---------------------------------------------------------------------------
# kernel A: per-position cLN statistics (PReLU -> channel sum / sum-of-squares)
# ---------------------------------------------------------------------------
def _stats_kernel(x_ref, o_ref):
    x = _prelu(x_ref[...])                                    # (tm, N) f32
    o_ref[:, 0:1] = jnp.sum(x, axis=-1, keepdims=True)
    o_ref[:, 1:2] = jnp.sum(x * x, axis=-1, keepdims=True)


def _cln_stats(x_flat, N):
    """Causal (cumulative) LayerNorm statistics over flattened segmented time.

    Matches the reference cLN: cumulative over the S*P positions, normalized by
    the running element count; eps inside the sqrt, var clamped >= 0.
    Returns (B*Lt, 2) with columns [mean, inv_std], all in f32.
    """
    B, Lt, _ = x_flat.shape
    sq = _row_call(_stats_kernel, [x_flat.reshape(B * Lt, N)], [], 2, live_cols=N)
    sq = sq.reshape(B, Lt, 2)
    cum = jnp.cumsum(sq, axis=1)                              # tiny (B, Lt, 2) scan
    cnt = (jnp.arange(1, Lt + 1, dtype=jnp.float32) * float(N))[None, :, None]
    mean = cum[..., 0:1] / cnt
    var = jnp.maximum(cum[..., 1:2] / cnt - mean * mean, 0.0)
    inv = jax.lax.rsqrt(var + EPS)
    return jnp.concatenate([mean, inv], axis=-1).reshape(B * Lt, 2)


# ---------------------------------------------------------------------------
# kernel B: cLN normalize -> conv2d 1x1 -> PReLU -> GALR blocks -> PReLU -> iconv
# ---------------------------------------------------------------------------
def _make_core_kernel(num_blocks):
    def kernel(*refs):
        x_ref, st_ref = refs[0], refs[1]
        g_ref, b_ref, cw_ref, cb_ref = refs[2:6]
        blk = refs[6:6 + 4 * num_blocks]
        iw_ref, ib_ref = refs[6 + 4 * num_blocks], refs[7 + 4 * num_blocks]
        o_ref = refs[-1]

        x = _prelu(x_ref[...])                                # PReLU after Segment1d
        mean = st_ref[:, 0:1]
        inv = st_ref[:, 1:2]
        y = (x - mean) * inv * g_ref[...] + b_ref[...]        # cLN (f32)

        # 1x1 conv2d (N -> Hc) + PReLU; bf16 MXU, f32 accumulate
        h = jnp.dot(y.astype(jnp.bfloat16), cw_ref[...],
                    preferred_element_type=jnp.float32) + cb_ref[...]
        h = _prelu(h)

        # TODO(synk): GALR_DCN internals are not given in the reference source;
        # substituted by fused residual channel-MLP blocks of matching I/O shape
        # (dropout omitted).
        for n in range(num_blocks):
            w1, b1, w2, b2 = blk[4 * n: 4 * n + 4]
            t = jnp.dot(h.astype(jnp.bfloat16), w1[...],
                        preferred_element_type=jnp.float32) + b1[...]
            t = jnp.maximum(t, 0.0)
            h = h + jnp.dot(t.astype(jnp.bfloat16), w2[...],
                            preferred_element_type=jnp.float32) + b2[...]

        # PReLU + iconv2d 1x1 (Hc -> N)
        h = _prelu(h)
        o_ref[...] = jnp.dot(h.astype(jnp.bfloat16), iw_ref[...],
                             preferred_element_type=jnp.float32) + ib_ref[...]
    return kernel


# ---------------------------------------------------------------------------
# kernel C: PReLU -> map 1x1 (N -> nS*N) -> per-source GTU1d -> ReLU mask
# ---------------------------------------------------------------------------
def _make_mask_kernel(n_sources, N):
    def kernel(x_ref, mw_ref, mb_ref, gw_ref, gbt_ref, gbs_ref, o_ref):
        x = _prelu(x_ref[...])                                # PReLU after crop
        m = jnp.dot(x.astype(jnp.bfloat16), mw_ref[...],
                    preferred_element_type=jnp.float32) + mb_ref[...]
        outs = []
        for s in range(n_sources):                            # shared GTU weights
            ms = m[:, s * N:(s + 1) * N].astype(jnp.bfloat16)
            g = jnp.dot(ms, gw_ref[...], preferred_element_type=jnp.float32)
            t = jnp.tanh(g[:, :N] + gbt_ref[...])
            sg = jax.nn.sigmoid(g[:, N:] + gbs_ref[...])
            outs.append(jnp.maximum(t * sg, 0.0))             # GTU1d -> ReLU mask
        o_ref[...] = jnp.concatenate(outs, axis=-1)           # lane-dense store
    return kernel


# ---------------------------------------------------------------------------
# Segment1d / OverlapAdd1d as cheap strided slices (no dense scatter matmul)
# ---------------------------------------------------------------------------
def _segment(x_cl, P, H):
    """x_cl: (B, Tp, N) -> (B, S, P, N) overlapping chunks (Segment1d)."""
    B, Tp, N = x_cl.shape
    S = (Tp - P) // H + 1
    if P % H == 0:
        r = P // H
        frames = x_cl.reshape(B, Tp // H, H, N)
        chunks = jnp.stack([frames[:, k:k + S] for k in range(r)], axis=2)
        return chunks.reshape(B, S, P, N)
    # TODO(synk): general (chunk_size % hop_size != 0) path uses an XLA gather.
    idx = (jnp.arange(S)[:, None] * H + jnp.arange(P)[None, :]).reshape(-1)
    return x_cl[:, idx, :].reshape(B, S, P, N)


def _overlap_add(y, Tp, H):
    """y: (B, S, P, N) -> (B, Tp, N), summing overlaps (OverlapAdd1d)."""
    B, S, P, N = y.shape
    if P % H == 0:
        r = P // H
        y5 = y.reshape(B, S, r, H, N)
        out = jnp.zeros((B, Tp // H, H, N), y.dtype)
        for k in range(r):
            out = out.at[:, k:k + S].add(y5[:, :, k])
        return out.reshape(B, Tp, N)
    idx = (jnp.arange(S)[:, None] * H + jnp.arange(P)[None, :]).reshape(-1)
    return jnp.zeros((B, Tp, N), y.dtype).at[:, idx, :].add(y.reshape(B, S * P, N))


# ---------------------------------------------------------------------------
# full forward pass
# ---------------------------------------------------------------------------
def separator_forward(x, params, *, chunk_size, hop_size, n_sources):
    B, N, T = x.shape
    P, H = chunk_size, hop_size
    Hc = params["conv_w"].shape[1]
    num_blocks = len(params["galr_blocks"])
    hidden = params["galr_blocks"][0][0].shape[1] if num_blocks else Hc

    padding = (H - (T - P) % H) % H
    pad_l, pad_r = padding // 2, padding - padding // 2
    x_cl = jnp.transpose(x, (0, 2, 1))                           # (B, T, N)
    x_cl = jnp.pad(x_cl, ((0, 0), (pad_l, pad_r), (0, 0)))
    Tp = T + padding
    S = (Tp - P) // H + 1

    xseg = _segment(x_cl, P, H)                                  # (B, S, P, N)
    Lt = S * P
    x_flat = xseg.reshape(B, Lt, N)

    # kernel A (parallel) + tiny XLA cumulative scan: causal cLN statistics
    stats = _cln_stats(x_flat, N)                                # (B*Lt, 2) f32

    # kernel B (parallel, fused): cLN normalize -> conv -> PReLU ->
    # all GALR blocks -> PReLU -> iconv; weights resident, bf16 matmuls.
    consts = [params["cln_gamma"], params["cln_beta"],
              params["conv_w"].astype(jnp.bfloat16), params["conv_b"].reshape(1, -1)]
    for (w1, b1, w2, b2) in params["galr_blocks"]:
        consts += [w1.astype(jnp.bfloat16), b1.reshape(1, -1),
                   w2.astype(jnp.bfloat16), b2.reshape(1, -1)]
    consts += [params["iconv_w"].astype(jnp.bfloat16),
               params["iconv_b"].reshape(1, -1)]
    y = _row_call(_make_core_kernel(num_blocks),
                  [x_flat.reshape(B * Lt, N), stats], consts, N,
                  live_cols=2 * Hc + hidden + N)                 # (B*Lt, N)

    # OverlapAdd1d + crop the time padding (pure data movement)
    y = _overlap_add(y.reshape(B, S, P, N), Tp, H)               # (B, Tp, N)
    y = y[:, pad_l:Tp - pad_r]                                   # (B, T, N)

    # kernel C (parallel, fused): PReLU -> map -> GTU1d (shared dense weights)
    # -> ReLU mask
    gw = jnp.concatenate([params["gtu_wt"], params["gtu_ws"]],
                         axis=1).astype(jnp.bfloat16)            # (N, 2N)
    consts_c = [params["map_w"].astype(jnp.bfloat16), params["map_b"].reshape(1, -1),
                gw, params["gtu_bt"].reshape(1, -1), params["gtu_bs"].reshape(1, -1)]
    out = _row_call(_make_mask_kernel(n_sources, N),
                    [y.reshape(B * T, N)], consts_c, n_sources * N,
                    live_cols=(3 + n_sources) * N)               # (B*T, nS*N)

    # TODO(synk): the final permute could be fused into the downstream
    # mask * mixture multiply; kept as a single XLA transpose here.
    out = out.reshape(B, T, n_sources, N).transpose(0, 2, 3, 1)  # (B, nS, N, T)
    return out


# ---------------------------------------------------------------------------
# deterministic parameter init (synthetic weights; shapes from module __init__)
# ---------------------------------------------------------------------------
def init_params(key, N, hidden_channels, num_blocks, n_sources):
    Hc = hidden_channels // 2
    keys = jax.random.split(key, 8 + 4 * num_blocks)

    def nrm(k, shape, scale=0.1):
        return scale * jax.random.normal(k, shape, jnp.float32)

    params = {
        "cln_gamma": jnp.ones((1, N), jnp.float32),
        "cln_beta": jnp.zeros((1, N), jnp.float32),
        "conv_w": nrm(keys[0], (N, Hc)),
        "conv_b": nrm(keys[1], (Hc,)),
        "iconv_w": nrm(keys[2], (Hc, N)),
        "iconv_b": nrm(keys[3], (N,)),
        "map_w": nrm(keys[4], (N, n_sources * N)),
        "map_b": nrm(keys[5], (n_sources * N,)),
        "gtu_wt": nrm(keys[6], (N, N)),
        "gtu_bt": jnp.zeros((N,), jnp.float32),
        "gtu_ws": nrm(keys[7], (N, N)),
        "gtu_bs": jnp.zeros((N,), jnp.float32),
    }
    blocks = []
    for i in range(num_blocks):
        k1, k2, k3, k4 = keys[8 + 4 * i: 8 + 4 * i + 4]
        blocks.append((nrm(k1, (Hc, hidden_channels)), nrm(k2, (hidden_channels,)),
                       nrm(k3, (hidden_channels, Hc)), nrm(k4, (Hc,))))
    params["galr_blocks"] = blocks
    return params


if __name__ == "__main__":
    key = jax.random.PRNGKey(0)
    kx, kp = jax.random.split(key)

    # small shapes consistent with the module's forward contract
    B, N, T = 2, 8, 16          # batch, num_features, n_frames
    hidden_channels = 16        # -> Hc = 8 inside the separator
    chunk_size, hop_size = 8, 4
    num_blocks = 2
    n_sources = 2

    x = jax.random.normal(kx, (B, N, T), jnp.float32)
    params = init_params(kp, N, hidden_channels, num_blocks, n_sources)

    fwd = jax.jit(lambda xx: separator_forward(
        xx, params, chunk_size=chunk_size, hop_size=hop_size, n_sources=n_sources))
    out = jax.block_until_ready(fwd(x))
    assert out.shape == (B, n_sources, N, T), out.shape
    assert bool(jnp.all(jnp.isfinite(out)))
    print("KERNEL_OK")
</pallas_src>

<mosaic_0001>
module attributes {stable_mosaic.version = 11 : i64} {
  func.func @_stats_kernel(%arg0: i32, %arg1: memref<48x8xf32, #tpu.memory_space<vmem>>, %arg2: memref<48x2xf32, #tpu.memory_space<vmem>>) attributes {dimension_semantics = [#tpu.dimension_semantics<parallel>], iteration_bounds = array<i64: 1>, scalar_prefetch = 0 : i64, scratch_operands = 0 : i64, tpu.core_type = #tpu.core_type<tc>, window_params = [{transform_indices = @transform_0, window_bounds = array<i64: 48, 8>}, {transform_indices = @transform_1, window_bounds = array<i64: 48, 2>}]} {
    %c0 = arith.constant 0 : index
    %c0_0 = arith.constant 0 : index
    %0 = vector.load %arg1[%c0, %c0_0] : memref<48x8xf32, #tpu.memory_space<vmem>>, vector<48x8xf32>
    %cst = arith.constant 0.000000e+00 : f32
    %1 = vector.broadcast %cst : f32 to vector<48x8xf32>
    %2 = arith.cmpf ogt, %0, %1 : vector<48x8xf32>
    %cst_1 = arith.constant 2.500000e-01 : f32
    %3 = vector.broadcast %cst_1 : f32 to vector<48x8xf32>
    %4 = arith.mulf %3, %0 : vector<48x8xf32>
    %5 = arith.select %2, %0, %4 : vector<48x8xi1>, vector<48x8xf32>
    %cst_2 = arith.constant dense<0.000000e+00> : vector<48xf32>
    %6 = vector.multi_reduction <add>, %5, %cst_2 [1] : vector<48x8xf32> to vector<48xf32>
    %7 = vector.shape_cast %6 : vector<48xf32> to vector<48x1xf32>
    %c0_3 = arith.constant 0 : index
    %c0_4 = arith.constant 0 : index
    %8 = vector.load %arg2[%c0_3, %c0_4] : memref<48x2xf32, #tpu.memory_space<vmem>>, vector<48x1xf32>
    tpu.vector_store %arg2[%c0_3, %c0_4], %7 {strides = array<i32>} : memref<48x2xf32, #tpu.memory_space<vmem>>, vector<48x1xf32>,
    %9 = arith.mulf %5, %5 : vector<48x8xf32>
    %cst_5 = arith.constant dense<0.000000e+00> : vector<48xf32>
    %10 = vector.multi_reduction <add>, %9, %cst_5 [1] : vector<48x8xf32> to vector<48xf32>
    %11 = vector.shape_cast %10 : vector<48xf32> to vector<48x1xf32>
    %c0_6 = arith.constant 0 : index
    %c1 = arith.constant 1 : index
    %12 = vector.load %arg2[%c0_6, %c1] : memref<48x2xf32, #tpu.memory_space<vmem>>, vector<48x1xf32>
    tpu.vector_store %arg2[%c0_6, %c1], %11 {strides = array<i32>} : memref<48x2xf32, #tpu.memory_space<vmem>>, vector<48x1xf32>,
    return
  }
  func.func @transform_0(%arg0: i32) -> (i32, i32) {
    %c0_i32 = arith.constant 0 : i32
    %c0_i32_0 = arith.constant 0 : i32
    return %arg0, %c0_i32 : i32, i32
  }
  func.func @transform_1(%arg0: i32) -> (i32, i32) {
    %c0_i32 = arith.constant 0 : i32
    %c0_i32_0 = arith.constant 0 : i32
    return %arg0, %c0_i32 : i32, i32
  }
}

module attributes {stable_mosaic.version = 11 : i64} {
  func.func @kernel(%arg0: i32, %arg1: memref<48x8xf32, #tpu.memory_space<vmem>>, %arg2: memref<48x2xf32, #tpu.memory_space<vmem>>, %arg3: memref<1x8xf32, #tpu.memory_space<vmem>>, %arg4: memref<1x8xf32, #tpu.memory_space<vmem>>, %arg5: memref<8x8xbf16, #tpu.memory_space<vmem>>, %arg6: memref<1x8xf32, #tpu.memory_space<vmem>>, %arg7: memref<8x16xbf16, #tpu.memory_space<vmem>>, %arg8: memref<1x16xf32, #tpu.memory_space<vmem>>, %arg9: memref<16x8xbf16, #tpu.memory_space<vmem>>, %arg10: memref<1x8xf32, #tpu.memory_space<vmem>>, %arg11: memref<8x16xbf16, #tpu.memory_space<vmem>>, %arg12: memref<1x16xf32, #tpu.memory_space<vmem>>, %arg13: memref<16x8xbf16, #tpu.memory_space<vmem>>, %arg14: memref<1x8xf32, #tpu.memory_space<vmem>>, %arg15: memref<8x8xbf16, #tpu.memory_space<vmem>>, %arg16: memref<1x8xf32, #tpu.memory_space<vmem>>, %arg17: memref<48x8xf32, #tpu.memory_space<vmem>>) attributes {dimension_semantics = [#tpu.dimension_semantics<parallel>], iteration_bounds = array<i64: 1>, scalar_prefetch = 0 : i64, scratch_operands = 0 : i64, tpu.core_type = #tpu.core_type<tc>, window_params = [{transform_indices = @transform_0, window_bounds = array<i64: 48, 8>}, {transform_indices = @transform_1, window_bounds = array<i64: 48, 2>}, {pipeline_mode = #tpu.pipeline_mode<synchronous>, transform_indices = @transform_2, window_bounds = array<i64: 1, 8>}, {pipeline_mode = #tpu.pipeline_mode<synchronous>, transform_indices = @transform_3, window_bounds = array<i64: 1, 8>}, {pipeline_mode = #tpu.pipeline_mode<synchronous>, transform_indices = @transform_4, window_bounds = array<i64: 8, 8>}, {pipeline_mode = #tpu.pipeline_mode<synchronous>, transform_indices = @transform_5, window_bounds = array<i64: 1, 8>}, {pipeline_mode = #tpu.pipeline_mode<synchronous>, transform_indices = @transform_6, window_bounds = array<i64: 8, 16>}, {pipeline_mode = #tpu.pipeline_mode<synchronous>, transform_indices = @transform_7, window_bounds = array<i64: 1, 16>}, {pipeline_mode = #tpu.pipeline_mode<synchronous>, transform_indices = @transform_8, window_bounds = array<i64: 16, 8>}, {pipeline_mode = #tpu.pipeline_mode<synchronous>, transform_indices = @transform_9, window_bounds = array<i64: 1, 8>}, {pipeline_mode = #tpu.pipeline_mode<synchronous>, transform_indices = @transform_10, window_bounds = array<i64: 8, 16>}, {pipeline_mode = #tpu.pipeline_mode<synchronous>, transform_indices = @transform_11, window_bounds = array<i64: 1, 16>}, {pipeline_mode = #tpu.pipeline_mode<synchronous>, transform_indices = @transform_12, window_bounds = array<i64: 16, 8>}, {pipeline_mode = #tpu.pipeline_mode<synchronous>, transform_indices = @transform_13, window_bounds = array<i64: 1, 8>}, {pipeline_mode = #tpu.pipeline_mode<synchronous>, transform_indices = @transform_14, window_bounds = array<i64: 8, 8>}, {pipeline_mode = #tpu.pipeline_mode<synchronous>, transform_indices = @transform_15, window_bounds = array<i64: 1, 8>}, {transform_indices = @transform_16, window_bounds = array<i64: 48, 8>}]} {
    %c0 = arith.constant 0 : index
    %c0_0 = arith.constant 0 : index
    %0 = vector.load %arg1[%c0, %c0_0] : memref<48x8xf32, #tpu.memory_space<vmem>>, vector<48x8xf32>
    %cst = arith.constant 0.000000e+00 : f32
    %1 = vector.broadcast %cst : f32 to vector<48x8xf32>
    %2 = arith.cmpf ogt, %0, %1 : vector<48x8xf32>
    %cst_1 = arith.constant 2.500000e-01 : f32
    %3 = vector.broadcast %cst_1 : f32 to vector<48x8xf32>
    %4 = arith.mulf %3, %0 : vector<48x8xf32>
    %5 = arith.select %2, %0, %4 : vector<48x8xi1>, vector<48x8xf32>
    %c0_2 = arith.constant 0 : index
    %c0_3 = arith.constant 0 : index
    %6 = vector.load %arg2[%c0_2, %c0_3] : memref<48x2xf32, #tpu.memory_space<vmem>>, vector<48x1xf32>
    %c0_4 = arith.constant 0 : index
    %c1 = arith.constant 1 : index
    %7 = vector.load %arg2[%c0_4, %c1] : memref<48x2xf32, #tpu.memory_space<vmem>>, vector<48x1xf32>
    %8 = vector.broadcast %6 : vector<48x1xf32> to vector<48x8xf32>
    %9 = arith.subf %5, %8 : vector<48x8xf32>
    %10 = vector.broadcast %7 : vector<48x1xf32> to vector<48x8xf32>
    %11 = arith.mulf %9, %10 : vector<48x8xf32>
    %c0_5 = arith.constant 0 : index
    %c0_6 = arith.constant 0 : index
    %12 = vector.load %arg3[%c0_5, %c0_6] : memref<1x8xf32, #tpu.memory_space<vmem>>, vector<1x8xf32>
    %13 = vector.broadcast %12 : vector<1x8xf32> to vector<48x8xf32>
    %14 = arith.mulf %11, %13 : vector<48x8xf32>
    %c0_7 = arith.constant 0 : index
    %c0_8 = arith.constant 0 : index
    %15 = vector.load %arg4[%c0_7, %c0_8] : memref<1x8xf32, #tpu.memory_space<vmem>>, vector<1x8xf32>
    %16 = vector.broadcast %15 : vector<1x8xf32> to vector<48x8xf32>
    %17 = arith.addf %14, %16 : vector<48x8xf32>
    %18 = arith.truncf %17 : vector<48x8xf32> to vector<48x8xbf16>
    %c0_9 = arith.constant 0 : index
    %c0_10 = arith.constant 0 : index
    %19 = vector.load %arg5[%c0_9, %c0_10] : memref<8x8xbf16, #tpu.memory_space<vmem>>, vector<8x8xbf16>
    %cst_11 = arith.constant dense<0.000000e+00> : vector<48x8xf32>
    %20 = tpu.matmul %18, %19, %cst_11 {dimension_numbers = #tpu.dot_dimension_numbers<[1], [0], [0], [1], [0, 0, 1, 1], [], []>} : vector<48x8xbf16>, vector<8x8xbf16>, vector<48x8xf32> -> vector<48x8xf32>
    %c0_12 = arith.constant 0 : index
    %c0_13 = arith.constant 0 : index
    %21 = vector.load %arg6[%c0_12, %c0_13] : memref<1x8xf32, #tpu.memory_space<vmem>>, vector<1x8xf32>
    %22 = vector.broadcast %21 : vector<1x8xf32> to vector<48x8xf32>
    %23 = arith.addf %20, %22 : vector<48x8xf32>
    %cst_14 = arith.constant 0.000000e+00 : f32
    %24 = vector.broadcast %cst_14 : f32 to vector<48x8xf32>
    %25 = arith.cmpf ogt, %23, %24 : vector<48x8xf32>
    %cst_15 = arith.constant 2.500000e-01 : f32
    %26 = vector.broadcast %cst_15 : f32 to vector<48x8xf32>
    %27 = arith.mulf %26, %23 : vector<48x8xf32>
    %28 = arith.select %25, %23, %27 : vector<48x8xi1>, vector<48x8xf32>
    %29 = arith.truncf %28 : vector<48x8xf32> to vector<48x8xbf16>
    %c0_16 = arith.constant 0 : index
    %c0_17 = arith.constant 0 : index
    %30 = vector.load %arg7[%c0_16, %c0_17] : memref<8x16xbf16, #tpu.memory_space<vmem>>, vector<8x16xbf16>
    %cst_18 = arith.constant dense<0.000000e+00> : vector<48x16xf32>
    %31 = tpu.matmul %29, %30, %cst_18 {dimension_numbers = #tpu.dot_dimension_numbers<[1], [0], [0], [1], [0, 0, 1, 1], [], []>} : vector<48x8xbf16>, vector<8x16xbf16>, vector<48x16xf32> -> vector<48x16xf32>
    %c0_19 = arith.constant 0 : index
    %c0_20 = arith.constant 0 : index
    %32 = vector.load %arg8[%c0_19, %c0_20] : memref<1x16xf32, #tpu.memory_space<vmem>>, vector<1x16xf32>
    %33 = vector.broadcast %32 : vector<1x16xf32> to vector<48x16xf32>
    %34 = arith.addf %31, %33 : vector<48x16xf32>
    %cst_21 = arith.constant 0.000000e+00 : f32
    %35 = vector.broadcast %cst_21 : f32 to vector<48x16xf32>
    %36 = arith.maximumf %34, %35 : vector<48x16xf32>
    %37 = arith.truncf %36 : vector<48x16xf32> to vector<48x16xbf16>
    %c0_22 = arith.constant 0 : index
    %c0_23 = arith.constant 0 : index
    %38 = vector.load %arg9[%c0_22, %c0_23] : memref<16x8xbf16, #tpu.memory_space<vmem>>, vector<16x8xbf16>
    %cst_24 = arith.constant dense<0.000000e+00> : vector<48x8xf32>
    %39 = tpu.matmul %37, %38, %cst_24 {dimension_numbers = #tpu.dot_dimension_numbers<[1], [0], [0], [1], [0, 0, 1, 1], [], []>} : vector<48x16xbf16>, vector<16x8xbf16>, vector<48x8xf32> -> vector<48x8xf32>
    %40 = arith.addf %28, %39 : vector<48x8xf32>
    %c0_25 = arith.constant 0 : index
    %c0_26 = arith.constant 0 : index
    %41 = vector.load %arg10[%c0_25, %c0_26] : memref<1x8xf32, #tpu.memory_space<vmem>>, vector<1x8xf32>
    %42 = vector.broadcast %41 : vector<1x8xf32> to vector<48x8xf32>
    %43 = arith.addf %40, %42 : vector<48x8xf32>
    %44 = arith.truncf %43 : vector<48x8xf32> to vector<48x8xbf16>
    %c0_27 = arith.constant 0 : index
    %c0_28 = arith.constant 0 : index
    %45 = vector.load %arg11[%c0_27, %c0_28] : memref<8x16xbf16, #tpu.memory_space<vmem>>, vector<8x16xbf16>
    %cst_29 = arith.constant dense<0.000000e+00> : vector<48x16xf32>
    %46 = tpu.matmul %44, %45, %cst_29 {dimension_numbers = #tpu.dot_dimension_numbers<[1], [0], [0], [1], [0, 0, 1, 1], [], []>} : vector<48x8xbf16>, vector<8x16xbf16>, vector<48x16xf32> -> vector<48x16xf32>
    %c0_30 = arith.constant 0 : index
    %c0_31 = arith.constant 0 : index
    %47 = vector.load %arg12[%c0_30, %c0_31] : memref<1x16xf32, #tpu.memory_space<vmem>>, vector<1x16xf32>
    %48 = vector.broadcast %47 : vector<1x16xf32> to vector<48x16xf32>
    %49 = arith.addf %46, %48 : vector<48x16xf32>
    %cst_32 = arith.constant 0.000000e+00 : f32
    %50 = vector.broadcast %cst_32 : f32 to vector<48x16xf32>
    %51 = arith.maximumf %49, %50 : vector<48x16xf32>
    %52 = arith.truncf %51 : vector<48x16xf32> to vector<48x16xbf16>
    %c0_33 = arith.constant 0 : index
    %c0_34 = arith.constant 0 : index
    %53 = vector.load %arg13[%c0_33, %c0_34] : memref<16x8xbf16, #tpu.memory_space<vmem>>, vector<16x8xbf16>
    %cst_35 = arith.constant dense<0.000000e+00> : vector<48x8xf32>
    %54 = tpu.matmul %52, %53, %cst_35 {dimension_numbers = #tpu.dot_dimension_numbers<[1], [0], [0], [1], [0, 0, 1, 1], [], []>} : vector<48x16xbf16>, vector<16x8xbf16>, vector<48x8xf32> -> vector<48x8xf32>
    %55 = arith.addf %43, %54 : vector<48x8xf32>
    %c0_36 = arith.constant 0 : index
    %c0_37 = arith.constant 0 : index
    %56 = vector.load %arg14[%c0_36, %c0_37] : memref<1x8xf32, #tpu.memory_space<vmem>>, vector<1x8xf32>
    %57 = vector.broadcast %56 : vector<1x8xf32> to vector<48x8xf32>
    %58 = arith.addf %55, %57 : vector<48x8xf32>
    %cst_38 = arith.constant 0.000000e+00 : f32
    %59 = vector.broadcast %cst_38 : f32 to vector<48x8xf32>
    %60 = arith.cmpf ogt, %58, %59 : vector<48x8xf32>
    %cst_39 = arith.constant 2.500000e-01 : f32
    %61 = vector.broadcast %cst_39 : f32 to vector<48x8xf32>
    %62 = arith.mulf %61, %58 : vector<48x8xf32>
    %63 = arith.select %60, %58, %62 : vector<48x8xi1>, vector<48x8xf32>
    %64 = arith.truncf %63 : vector<48x8xf32> to vector<48x8xbf16>
    %c0_40 = arith.constant 0 : index
    %c0_41 = arith.constant 0 : index
    %65 = vector.load %arg15[%c0_40, %c0_41] : memref<8x8xbf16, #tpu.memory_space<vmem>>, vector<8x8xbf16>
    %cst_42 = arith.constant dense<0.000000e+00> : vector<48x8xf32>
    %66 = tpu.matmul %64, %65, %cst_42 {dimension_numbers = #tpu.dot_dimension_numbers<[1], [0], [0], [1], [0, 0, 1, 1], [], []>} : vector<48x8xbf16>, vector<8x8xbf16>, vector<48x8xf32> -> vector<48x8xf32>
    %c0_43 = arith.constant 0 : index
    %c0_44 = arith.constant 0 : index
    %67 = vector.load %arg16[%c0_43, %c0_44] : memref<1x8xf32, #tpu.memory_space<vmem>>, vector<1x8xf32>
    %68 = vector.broadcast %67 : vector<1x8xf32> to vector<48x8xf32>
    %69 = arith.addf %66, %68 : vector<48x8xf32>
    %c0_45 = arith.constant 0 : index
    %c0_46 = arith.constant 0 : index
    %70 = vector.load %arg17[%c0_45, %c0_46] : memref<48x8xf32, #tpu.memory_space<vmem>>, vector<48x8xf32>
    tpu.vector_store %arg17[%c0_45, %c0_46], %69 {strides = array<i32>} : memref<48x8xf32, #tpu.memory_space<vmem>>, vector<48x8xf32>,
    return
  }
  func.func @transform_0(%arg0: i32) -> (i32, i32) {
    %c0_i32 = arith.constant 0 : i32
    %c0_i32_0 = arith.constant 0 : i32
    return %arg0, %c0_i32 : i32, i32
  }
  func.func @transform_1(%arg0: i32) -> (i32, i32) {
    %c0_i32 = arith.constant 0 : i32
    %c0_i32_0 = arith.constant 0 : i32
    return %arg0, %c0_i32 : i32, i32
  }
  func.func @transform_2(%arg0: i32) -> (i32, i32) {
    %c0_i32 = arith.constant 0 : i32
    %c0_i32_0 = arith.constant 0 : i32
    %c0_i32_1 = arith.constant 0 : i32
    return %c0_i32, %c0_i32_0 : i32, i32
  }
  func.func @transform_3(%arg0: i32) -> (i32, i32) {
    %c0_i32 = arith.constant 0 : i32
    %c0_i32_0 = arith.constant 0 : i32
    %c0_i32_1 = arith.constant 0 : i32
    return %c0_i32, %c0_i32_0 : i32, i32
  }
  func.func @transform_4(%arg0: i32) -> (i32, i32) {
    %c0_i32 = arith.constant 0 : i32
    %c0_i32_0 = arith.constant 0 : i32
    %c0_i32_1 = arith.constant 0 : i32
    return %c0_i32, %c0_i32_0 : i32, i32
  }
  func.func @transform_5(%arg0: i32) -> (i32, i32) {
    %c0_i32 = arith.constant 0 : i32
    %c0_i32_0 = arith.constant 0 : i32
    %c0_i32_1 = arith.constant 0 : i32
    return %c0_i32, %c0_i32_0 : i32, i32
  }
  func.func @transform_6(%arg0: i32) -> (i32, i32) {
    %c0_i32 = arith.constant 0 : i32
    %c0_i32_0 = arith.constant 0 : i32
    %c0_i32_1 = arith.constant 0 : i32
    return %c0_i32, %c0_i32_0 : i32, i32
  }
  func.func @transform_7(%arg0: i32) -> (i32, i32) {
    %c0_i32 = arith.constant 0 : i32
    %c0_i32_0 = arith.constant 0 : i32
    %c0_i32_1 = arith.constant 0 : i32
    return %c0_i32, %c0_i32_0 : i32, i32
  }
  func.func @transform_8(%arg0: i32) -> (i32, i32) {
    %c0_i32 = arith.constant 0 : i32
    %c0_i32_0 = arith.constant 0 : i32
    %c0_i32_1 = arith.constant 0 : i32
    return %c0_i32, %c0_i32_0 : i32, i32
  }
  func.func @transform_9(%arg0: i32) -> (i32, i32) {
    %c0_i32 = arith.constant 0 : i32
    %c0_i32_0 = arith.constant 0 : i32
    %c0_i32_1 = arith.constant 0 : i32
    return %c0_i32, %c0_i32_0 : i32, i32
  }
  func.func @transform_10(%arg0: i32) -> (i32, i32) {
    %c0_i32 = arith.constant 0 : i32
    %c0_i32_0 = arith.constant 0 : i32
    %c0_i32_1 = arith.constant 0 : i32
    return %c0_i32, %c0_i32_0 : i32, i32
  }
  func.func @transform_11(%arg0: i32) -> (i32, i32) {
    %c0_i32 = arith.constant 0 : i32
    %c0_i32_0 = arith.constant 0 : i32
    %c0_i32_1 = arith.constant 0 : i32
    return %c0_i32, %c0_i32_0 : i32, i32
  }
  func.func @transform_12(%arg0: i32) -> (i32, i32) {
    %c0_i32 = arith.constant 0 : i32
    %c0_i32_0 = arith.constant 0 : i32
    %c0_i32_1 = arith.constant 0 : i32
    return %c0_i32, %c0_i32_0 : i32, i32
  }
  func.func @transform_13(%arg0: i32) -> (i32, i32) {
    %c0_i32 = arith.constant 0 : i32
    %c0_i32_0 = arith.constant 0 : i32
    %c0_i32_1 = arith.constant 0 : i32
    return %c0_i32, %c0_i32_0 : i32, i32
  }
  func.func @transform_14(%arg0: i32) -> (i32, i32) {
    %c0_i32 = arith.constant 0 : i32
    %c0_i32_0 = arith.constant 0 : i32
    %c0_i32_1 = arith.constant 0 : i32
    return %c0_i32, %c0_i32_0 : i32, i32
  }
  func.func @transform_15(%arg0: i32) -> (i32, i32) {
    %c0_i32 = arith.constant 0 : i32
    %c0_i32_0 = arith.constant 0 : i32
    %c0_i32_1 = arith.constant 0 : i32
    return %c0_i32, %c0_i32_0 : i32, i32
  }
  func.func @transform_16(%arg0: i32) -> (i32, i32) {
    %c0_i32 = arith.constant 0 : i32
    %c0_i32_0 = arith.constant 0 : i32
    return %arg0, %c0_i32 : i32, i32
  }
}

module attributes {stable_mosaic.version = 11 : i64} {
  func.func @kernel(%arg0: i32, %arg1: memref<32x8xf32, #tpu.memory_space<vmem>>, %arg2: memref<8x16xbf16, #tpu.memory_space<vmem>>, %arg3: memref<1x16xf32, #tpu.memory_space<vmem>>, %arg4: memref<8x16xbf16, #tpu.memory_space<vmem>>, %arg5: memref<1x8xf32, #tpu.memory_space<vmem>>, %arg6: memref<1x8xf32, #tpu.memory_space<vmem>>, %arg7: memref<32x16xf32, #tpu.memory_space<vmem>>) attributes {dimension_semantics = [#tpu.dimension_semantics<parallel>], iteration_bounds = array<i64: 1>, scalar_prefetch = 0 : i64, scratch_operands = 0 : i64, tpu.core_type = #tpu.core_type<tc>, window_params = [{transform_indices = @transform_0, window_bounds = array<i64: 32, 8>}, {pipeline_mode = #tpu.pipeline_mode<synchronous>, transform_indices = @transform_1, window_bounds = array<i64: 8, 16>}, {pipeline_mode = #tpu.pipeline_mode<synchronous>, transform_indices = @transform_2, window_bounds = array<i64: 1, 16>}, {pipeline_mode = #tpu.pipeline_mode<synchronous>, transform_indices = @transform_3, window_bounds = array<i64: 8, 16>}, {pipeline_mode = #tpu.pipeline_mode<synchronous>, transform_indices = @transform_4, window_bounds = array<i64: 1, 8>}, {pipeline_mode = #tpu.pipeline_mode<synchronous>, transform_indices = @transform_5, window_bounds = array<i64: 1, 8>}, {transform_indices = @transform_6, window_bounds = array<i64: 32, 16>}]} {
    %c0 = arith.constant 0 : index
    %c0_0 = arith.constant 0 : index
    %0 = vector.load %arg1[%c0, %c0_0] : memref<32x8xf32, #tpu.memory_space<vmem>>, vector<32x8xf32>
    %cst = arith.constant 0.000000e+00 : f32
    %1 = vector.broadcast %cst : f32 to vector<32x8xf32>
    %2 = arith.cmpf ogt, %0, %1 : vector<32x8xf32>
    %cst_1 = arith.constant 2.500000e-01 : f32
    %3 = vector.broadcast %cst_1 : f32 to vector<32x8xf32>
    %4 = arith.mulf %3, %0 : vector<32x8xf32>
    %5 = arith.select %2, %0, %4 : vector<32x8xi1>, vector<32x8xf32>
    %6 = arith.truncf %5 : vector<32x8xf32> to vector<32x8xbf16>
    %c0_2 = arith.constant 0 : index
    %c0_3 = arith.constant 0 : index
    %7 = vector.load %arg2[%c0_2, %c0_3] : memref<8x16xbf16, #tpu.memory_space<vmem>>, vector<8x16xbf16>
    %cst_4 = arith.constant dense<0.000000e+00> : vector<32x16xf32>
    %8 = tpu.matmul %6, %7, %cst_4 {dimension_numbers = #tpu.dot_dimension_numbers<[1], [0], [0], [1], [0, 0, 1, 1], [], []>} : vector<32x8xbf16>, vector<8x16xbf16>, vector<32x16xf32> -> vector<32x16xf32>
    %c0_5 = arith.constant 0 : index
    %c0_6 = arith.constant 0 : index
    %9 = vector.load %arg3[%c0_5, %c0_6] : memref<1x16xf32, #tpu.memory_space<vmem>>, vector<1x16xf32>
    %10 = vector.broadcast %9 : vector<1x16xf32> to vector<32x16xf32>
    %11 = arith.addf %8, %10 : vector<32x16xf32>
    %12 = vector.extract_strided_slice %11 {offsets = [0, 0], sizes = [32, 8], strides = [1, 1]} : vector<32x16xf32> to vector<32x8xf32>
    %13 = arith.truncf %12 : vector<32x8xf32> to vector<32x8xbf16>
    %c0_7 = arith.constant 0 : index
    %c0_8 = arith.constant 0 : index
    %14 = vector.load %arg4[%c0_7, %c0_8] : memref<8x16xbf16, #tpu.memory_space<vmem>>, vector<8x16xbf16>
    %cst_9 = arith.constant dense<0.000000e+00> : vector<32x16xf32>
    %15 = tpu.matmul %13, %14, %cst_9 {dimension_numbers = #tpu.dot_dimension_numbers<[1], [0], [0], [1], [0, 0, 1, 1], [], []>} : vector<32x8xbf16>, vector<8x16xbf16>, vector<32x16xf32> -> vector<32x16xf32>
    %16 = vector.extract_strided_slice %15 {offsets = [0, 0], sizes = [32, 8], strides = [1, 1]} : vector<32x16xf32> to vector<32x8xf32>
    %c0_10 = arith.constant 0 : index
    %c0_11 = arith.constant 0 : index
    %17 = vector.load %arg5[%c0_10, %c0_11] : memref<1x8xf32, #tpu.memory_space<vmem>>, vector<1x8xf32>
    %18 = vector.broadcast %17 : vector<1x8xf32> to vector<32x8xf32>
    %19 = arith.addf %16, %18 : vector<32x8xf32>
    %20 = math.tanh %19 : vector<32x8xf32>
    %21 = vector.extract_strided_slice %15 {offsets = [0, 8], sizes = [32, 8], strides = [1, 1]} : vector<32x16xf32> to vector<32x8xf32>
    %c0_12 = arith.constant 0 : index
    %c0_13 = arith.constant 0 : index
    %22 = vector.load %arg6[%c0_12, %c0_13] : memref<1x8xf32, #tpu.memory_space<vmem>>, vector<1x8xf32>
    %23 = vector.broadcast %22 : vector<1x8xf32> to vector<32x8xf32>
    %24 = arith.addf %21, %23 : vector<32x8xf32>
    %25 = arith.negf %24 : vector<32x8xf32>
    %26 = math.exp %25 : vector<32x8xf32>
    %cst_14 = arith.constant 1.000000e+00 : f32
    %27 = vector.broadcast %cst_14 : f32 to vector<32x8xf32>
    %28 = arith.addf %27, %26 : vector<32x8xf32>
    %29 = arith.divf %27, %28 : vector<32x8xf32>
    %30 = arith.mulf %20, %29 : vector<32x8xf32>
    %cst_15 = arith.constant 0.000000e+00 : f32
    %31 = vector.broadcast %cst_15 : f32 to vector<32x8xf32>
    %32 = arith.maximumf %30, %31 : vector<32x8xf32>
    %33 = vector.extract_strided_slice %11 {offsets = [0, 8], sizes = [32, 8], strides = [1, 1]} : vector<32x16xf32> to vector<32x8xf32>
    %34 = arith.truncf %33 : vector<32x8xf32> to vector<32x8xbf16>
    %c0_16 = arith.constant 0 : index
    %c0_17 = arith.constant 0 : index
    %35 = vector.load %arg4[%c0_16, %c0_17] : memref<8x16xbf16, #tpu.memory_space<vmem>>, vector<8x16xbf16>
    %cst_18 = arith.constant dense<0.000000e+00> : vector<32x16xf32>
    %36 = tpu.matmul %34, %35, %cst_18 {dimension_numbers = #tpu.dot_dimension_numbers<[1], [0], [0], [1], [0, 0, 1, 1], [], []>} : vector<32x8xbf16>, vector<8x16xbf16>, vector<32x16xf32> -> vector<32x16xf32>
    %37 = vector.extract_strided_slice %36 {offsets = [0, 0], sizes = [32, 8], strides = [1, 1]} : vector<32x16xf32> to vector<32x8xf32>
    %c0_19 = arith.constant 0 : index
    %c0_20 = arith.constant 0 : index
    %38 = vector.load %arg5[%c0_19, %c0_20] : memref<1x8xf32, #tpu.memory_space<vmem>>, vector<1x8xf32>
    %39 = vector.broadcast %38 : vector<1x8xf32> to vector<32x8xf32>
    %40 = arith.addf %37, %39 : vector<32x8xf32>
    %41 = math.tanh %40 : vector<32x8xf32>
    %42 = vector.extract_strided_slice %36 {offsets = [0, 8], sizes = [32, 8], strides = [1, 1]} : vector<32x16xf32> to vector<32x8xf32>
    %c0_21 = arith.constant 0 : index
    %c0_22 = arith.constant 0 : index
    %43 = vector.load %arg6[%c0_21, %c0_22] : memref<1x8xf32, #tpu.memory_space<vmem>>, vector<1x8xf32>
    %44 = vector.broadcast %43 : vector<1x8xf32> to vector<32x8xf32>
    %45 = arith.addf %42, %44 : vector<32x8xf32>
    %46 = arith.negf %45 : vector<32x8xf32>
    %47 = math.exp %46 : vector<32x8xf32>
    %cst_23 = arith.constant 1.000000e+00 : f32
    %48 = vector.broadcast %cst_23 : f32 to vector<32x8xf32>
    %49 = arith.addf %48, %47 : vector<32x8xf32>
    %50 = arith.divf %48, %49 : vector<32x8xf32>
    %51 = arith.mulf %41, %50 : vector<32x8xf32>
    %cst_24 = arith.constant 0.000000e+00 : f32
    %52 = vector.broadcast %cst_24 : f32 to vector<32x8xf32>
    %53 = arith.maximumf %51, %52 : vector<32x8xf32>
    %54 = tpu.concatenate %32, %53 in 1 : vector<32x8xf32>, vector<32x8xf32> -> vector<32x16xf32>
    %c0_25 = arith.constant 0 : index
    %c0_26 = arith.constant 0 : index
    %55 = vector.load %arg7[%c0_25, %c0_26] : memref<32x16xf32, #tpu.memory_space<vmem>>, vector<32x16xf32>
    tpu.vector_store %arg7[%c0_25, %c0_26], %54 {strides = array<i32>} : memref<32x16xf32, #tpu.memory_space<vmem>>, vector<32x16xf32>,
    return
  }
  func.func @transform_0(%arg0: i32) -> (i32, i32) {
    %c0_i32 = arith.constant 0 : i32
    %c0_i32_0 = arith.constant 0 : i32
    return %arg0, %c0_i32 : i32, i32
  }
  func.func @transform_1(%arg0: i32) -> (i32, i32) {
    %c0_i32 = arith.constant 0 : i32
    %c0_i32_0 = arith.constant 0 : i32
    %c0_i32_1 = arith.constant 0 : i32
    return %c0_i32, %c0_i32_0 : i32, i32
  }
  func.func @transform_2(%arg0: i32) -> (i32, i32) {
    %c0_i32 = arith.constant 0 : i32
    %c0_i32_0 = arith.constant 0 : i32
    %c0_i32_1 = arith.constant 0 : i32
    return %c0_i32, %c0_i32_0 : i32, i32
  }
  func.func @transform_3(%arg0: i32) -> (i32, i32) {
    %c0_i32 = arith.constant 0 : i32
    %c0_i32_0 = arith.constant 0 : i32
    %c0_i32_1 = arith.constant 0 : i32
    return %c0_i32, %c0_i32_0 : i32, i32
  }
  func.func @transform_4(%arg0: i32) -> (i32, i32) {
    %c0_i32 = arith.constant 0 : i32
    %c0_i32_0 = arith.constant 0 : i32
    %c0_i32_1 = arith.constant 0 : i32
    return %c0_i32, %c0_i32_0 : i32, i32
  }
  func.func @transform_5(%arg0: i32) -> (i32, i32) {
    %c0_i32 = arith.constant 0 : i32
    %c0_i32_0 = arith.constant 0 : i32
    %c0_i32_1 = arith.constant 0 : i32
    return %c0_i32, %c0_i32_0 : i32, i32
  }
  func.func @transform_6(%arg0: i32) -> (i32, i32) {
    %c0_i32 = arith.constant 0 : i32
    %c0_i32_0 = arith.constant 0 : i32
    return %arg0, %c0_i32 : i32, i32
  }
}

</mosaic_0001>

<bundles_post_ra>
// kernel: _lambda_.3
= control target key start
LH: loop header
LB: loop body
LE: loop exit
PB: predicated region body
PF: predicated region fallthrough
CT: control target
= control target key end

     0   :  { %vm32_vm0 = vcmask 64512   ;;  %vm51_vm7 = vcmask 7168   ;;  %vm82_vm8 = vcmask 15368   ;;  %s169_s0 = inlined_call_operand.vmem [shape: f32[48,8], index: 0, kind: input, shape index: {}]   ;;  %s170_s1 = inlined_call_operand.vmem [shape: f32[48,2], index: 1, kind: output, shape index: {}]  }
   0x1   :  { %v12_v0 = vld [vmem:[%s169_s0 + $0x20] sm:$0xff]  ;;  %v10_v1 = vld [vmem:[%s169_s0 + $0x10] sm:$0xff]  ;;  %v13_v5 = vld [vmem:[%s169_s0 + $0x28] sm:$0xff] }
   0x2   :  { %v8_v2 = vld [vmem:[%s169_s0] sm:$0xff]  ;;  %vm18_vm1 = vcmp.gt.f32.partialorder %v12_v0, 0.0  ;;  %v24_v3 = vmul.f32 0.25, %v12_v0  ;;  %vm16_vm2 = vcmp.gt.f32.partialorder %v10_v1, 0.0  ;;  %v22_v4 = vmul.f32 0.25, %v10_v1  ;;  %v11_v6 = vld [vmem:[%s169_s0 + $0x18] sm:$0xff] }
   0x3   :  { %vm14_vm3 = vcmp.gt.f32.partialorder %v8_v2, 0.0  ;;  %v20_v7 = vmul.f32 0.25, %v8_v2  ;;  %v25_v10 = vmul.f32 0.25, %v13_v5  ;;  %v23_v11 = vmul.f32 0.25, %v11_v6  ;;  %v9_v12 = vld [vmem:[%s169_s0 + $0x8] sm:$0xff] }
   0x4   :  { %v30_v8 = vsel %vm18_vm1, %v12_v0, %v24_v3  ;;  %v28_v9 = vsel %vm16_vm2, %v10_v1, %v22_v4  ;;  %vm19_vm4 = vcmp.gt.f32.partialorder %v13_v5, 0.0  ;;  %vm17_vm5 = vcmp.gt.f32.partialorder %v11_v6, 0.0 }
   0x5   :  { %v45_v13 = vsel %vm32_vm0, %v30_v8, 0.0  ;;  %v39_v14 = vsel %vm32_vm0, %v28_v9, 0.0  ;;  %v26_v15 = vsel %vm14_vm3, %v8_v2, %v20_v7  ;;  %vm15_vm6 = vcmp.gt.f32.partialorder %v9_v12, 0.0 }
   0x6   :  { %46 = vadd.xlane.f32.xlu2 %v45_v13  ;;  %40 = vadd.xlane.f32.xlu1 %v39_v14  ;;  %v33_v16 = vsel %vm32_vm0, %v26_v15, 0.0  ;;  %v31_v17 = vsel %vm19_vm4, %v13_v5, %v25_v10  ;;  %v29_v18 = vsel %vm17_vm5, %v11_v6, %v23_v11  ;;  %v21_v19 = vmul.f32 0.25, %v9_v12 }
   0x7   :  { %34 = vadd.xlane.f32.xlu0 %v33_v16  ;;  %v48_v21 = vsel %vm32_vm0, %v31_v17, 0.0  ;;  %v42_v22 = vsel %vm32_vm0, %v29_v18, 0.0  ;;  %v60_v24 = vmul.f32 %v28_v9, %v28_v9  ;;  %v58_v26 = vmul.f32 %v26_v15, %v26_v15 }
   0x8   :  { %v27_v20 = vsel %vm15_vm6, %v9_v12, %v21_v19  ;;  %v62_v30 = vmul.f32 %v30_v8, %v30_v8  ;;  %v63_v31 = vmul.f32 %v31_v17, %v31_v17  ;;  %v61_v32 = vmul.f32 %v29_v18, %v29_v18 }
   0x9   :  { %v36_v23 = vsel %vm32_vm0, %v27_v20, 0.0  ;;  %v59_v25 = vmul.f32 %v27_v20, %v27_v20  ;;  %v70_v27 = vsel %vm32_vm0, %v60_v24, 0.0  ;;  %v64_v29 = vsel %vm32_vm0, %v58_v26, 0.0 }
   0xa   :  { %v79_v33 = vsel %vm32_vm0, %v63_v31, 0.0  ;;  %v76_v34 = vsel %vm32_vm0, %v62_v30, 0.0  ;;  %v73_v35 = vsel %vm32_vm0, %v61_v32, 0.0 }
   0xb   :  { %v67_v28 = vsel %vm32_vm0, %v59_v25, 0.0 }
   0xe   :  { %49 = vadd.xlane.f32.xlu2 %v48_v21  ;;  %43 = vadd.xlane.f32.xlu1 %v42_v22 }
   0xf   :  { %37 = vadd.xlane.f32.xlu0 %v36_v23 }
  0x16   :  { %71 = vadd.xlane.f32.xlu2 %v70_v27  ;;  %68 = vadd.xlane.f32.xlu1 %v67_v28 }
  0x17   :  { %65 = vadd.xlane.f32.xlu0 %v64_v29 }
  0x1e   :  { %80 = vadd.xlane.f32.xlu2 %v79_v33  ;;  %77 = vadd.xlane.f32.xlu1 %v76_v34 }
  0x1f   :  { %74 = vadd.xlane.f32.xlu0 %v73_v35 }
  0x79   :  { %v47_v36 = vpop.xlane.xlu2 %46  ;;  %v41_v37 = vpop.xlane.xlu1 %40 }
  0x7a   :  { %56 = vst.msk [vmem:[%s170_s1 + $0x20] sm:$0xff] %vm51_vm7, %v47_v36  ;;  %v35_v38 = vpop.xlane.xlu0 %34 }
  0x7b   :  { %54 = vst.msk [vmem:[%s170_s1 + $0x10] sm:$0xff] %vm51_vm7, %v41_v37 }
  0x7c   :  { %52 = vst.msk [vmem:[%s170_s1] sm:$0xff] %vm51_vm7, %v35_v38 }
  0x81   :  { %v50_v39 = vpop.xlane.xlu2 %49  ;;  %v44_v40 = vpop.xlane.xlu1 %43 }
  0x82   :  { %57 = vst.msk [vmem:[%s170_s1 + $0x28] sm:$0xff] %vm51_vm7, %v50_v39  ;;  %v38_v41 = vpop.xlane.xlu0 %37 }
  0x83   :  { %55 = vst.msk [vmem:[%s170_s1 + $0x18] sm:$0xff] %vm51_vm7, %v44_v40 }
  0x84   :  { %53 = vst.msk [vmem:[%s170_s1 + $0x8] sm:$0xff] %vm51_vm7, %v38_v41 }
  0x89   :  { %v72_v42 = vpop.xlane.xlu2 %71  ;;  %v69_v43 = vpop.xlane.xlu1 %68 }
  0x8a   :  { %85 = vst.msk [vmem:[%s170_s1 + $0x10] sm:$0xff] %vm82_vm8, %v72_v42  ;;  %v66_v44 = vpop.xlane.xlu0 %65 }
  0x8b   :  { %84 = vst.msk [vmem:[%s170_s1 + $0x8] sm:$0xff] %vm82_vm8, %v69_v43 }
  0x8c   :  { %83 = vst.msk [vmem:[%s170_s1] sm:$0xff] %vm82_vm8, %v66_v44 }
  0x91   :  { %v81_v45 = vpop.xlane.xlu2 %80  ;;  %v78_v46 = vpop.xlane.xlu1 %77 }
  0x92   :  { %88 = vst.msk [vmem:[%s170_s1 + $0x28] sm:$0xff] %vm82_vm8, %v81_v45  ;;  %v75_v47 = vpop.xlane.xlu0 %74 }
  0x93   :  { %87 = vst.msk [vmem:[%s170_s1 + $0x20] sm:$0xff] %vm82_vm8, %v78_v46 }
  0x94   :  { %86 = vst.msk [vmem:[%s170_s1 + $0x18] sm:$0xff] %vm82_vm8, %v75_v47 }

// kernel: _lambda_.4
= control target key start
LH: loop header
LB: loop body
LE: loop exit
PB: predicated region body
PF: predicated region fallthrough
CT: control target
= control target key end

     0   :  { %v573_v0 = vmov 1   ;;  %v574_v1 = vmov 0   ;;  %vm188_vm0 = vcmask 1043456   ;;  %vm178_vm5 = vcmask 64512   ;;  %s800_s1 = inlined_call_operand.vmem [shape: f32[48,2], index: 1, kind: input, shape index: {}]   ;;  %s801_s2 = inlined_call_operand.vmem [shape: f32[1,8], index: 2, kind: input, shape index: {}]   ;;  %s802_s3 = inlined_call_operand.vmem [shape: f32[1,8], index: 3, kind: input, shape index: {}]   ;;  %s803_s5 = inlined_call_operand.vmem [shape: f32[1,8], index: 5, kind: input, shape index: {}]   ;;  %s804_s4 = inlined_call_operand.vmem [shape: bf16[8,8], index: 4, kind: input, shape index: {}]   ;;  %s805_s0 = inlined_call_operand.vmem [shape: f32[48,8], index: 0, kind: input, shape index: {}]   ;;  %s806_s7 = inlined_call_operand.vmem [shape: f32[1,16], index: 7, kind: input, shape index: {}]   ;;  %s807_s6 = inlined_call_operand.vmem [shape: bf16[8,16], index: 6, kind: input, shape index: {}]   ;;  %s808_s8 = inlined_call_operand.vmem [shape: bf16[16,8], index: 8, kind: input, shape index: {}]   ;;  %s809_s9 = inlined_call_operand.vmem [shape: f32[1,8], index: 9, kind: input, shape index: {}]   ;;  %s810_s10 = inlined_call_operand.vmem [shape: bf16[8,16], index: 10, kind: input, shape index: {}]   ;;  %s811_s11 = inlined_call_operand.vmem [shape: f32[1,16], index: 11, kind: input, shape index: {}]   ;;  %s812_s13 = inlined_call_operand.vmem [shape: f32[1,8], index: 13, kind: input, shape index: {}]   ;;  %s813_s12 = inlined_call_operand.vmem [shape: bf16[16,8], index: 12, kind: input, shape index: {}]   ;;  %s814_s15 = inlined_call_operand.vmem [shape: f32[1,8], index: 15, kind: input, shape index: {}]   ;;  %s815_s14 = inlined_call_operand.vmem [shape: bf16[8,8], index: 14, kind: input, shape index: {}]   ;;  %s816_s16 = inlined_call_operand.vmem [shape: f32[48,8], index: 16, kind: output, shape index: {}]  }
   0x1   :  { %818 = sst [smem:[#allocation2_spill]] %s800_s1  ;;  %560 = vset.pattern.permute.xlu1 %v573_v0  ;;  %559 = vset.pattern.permute.xlu0 %v574_v1  ;;  %v173_v8 = vld [vmem:[%s804_s4] sm:$0xf]  ;;  %v55_v13 = vld [vmem:[%s805_s0 + $0x8] sm:$0xff]  ;;  %v57_v19 = vld [vmem:[%s805_s0 + $0x18] sm:$0xff]  ;;  %vm295_vm14 = vcmask 130048  }
   0x2   :  { %s819_s23 = sld [smem:[#allocation2_spill]]  ;;  %561 = vset.pattern.permute.xlu2 %v574_v1  ;;  %v190_v9 = vsel %vm188_vm0, %v173_v8, 0  ;;  %v54_v10 = vld [vmem:[%s805_s0] sm:$0xff]  ;;  %v67_v17 = vmul.f32 0.25, %v55_v13  ;;  %vm61_vm2 = vcmp.gt.f32.partialorder %v55_v13, 0.0  ;;  %v56_v20 = vld [vmem:[%s805_s0 + $0x10] sm:$0xff] }
   0x3   :  { %199 = vmatpush.bf16.msra.mxu0 %v190_v9  ;;  %555 = vmatpush.bf16.msra.mxu2 %v190_v9  ;;  %v66_v11 = vmul.f32 0.25, %v54_v10  ;;  %vm60_vm1 = vcmp.gt.f32.partialorder %v54_v10, 0.0  ;;  %v565_v23 = vld [vmem:[%s801_s2] ss:$0 sm:$0xff]  ;;  %v69_v25 = vmul.f32 0.25, %v57_v19  ;;  %v68_v28 = vmul.f32 0.25, %v56_v20 }
   0x4   :  { %v73_v21 = vsel %vm61_vm2, %v55_v13, %v67_v17  ;;  %vm63_vm3 = vcmp.gt.f32.partialorder %v57_v19, 0.0  ;;  %vm62_vm4 = vcmp.gt.f32.partialorder %v56_v20, 0.0  ;;  %v566_v32 = vld [vmem:[%s802_s3] ss:$0 sm:$0xff]  ;;  %v59_v42 = vld [vmem:[%s805_s0 + $0x28] sm:$0xff] }
   0x5   :  { %v72_v16 = vsel %vm60_vm1, %v54_v10, %v66_v11  ;;  %v75_v33 = vsel %vm63_vm3, %v57_v19, %v69_v25  ;;  %v74_v34 = vsel %vm62_vm4, %v56_v20, %v68_v28  ;;  %v58_v40 = vld [vmem:[%s805_s0 + $0x20] sm:$0xff]  ;;  %v71_v50 = vmul.f32 0.25, %v59_v42 }
   0x6   :  { %v70_v48 = vmul.f32 0.25, %v58_v40  ;;  %vm64_vm6 = vcmp.gt.f32.partialorder %v58_v40, 0.0  ;;  %vm65_vm7 = vcmp.gt.f32.partialorder %v59_v42, 0.0  ;;  %v567_v8 = vld [vmem:[%s803_s5] ss:$0 sm:$0xff] }
   0x7   :  { %v77_v55 = vsel %vm65_vm7, %v59_v42, %v71_v50  ;;  %v553_v17 = vld [vmem:[%s808_s8] sm:$0xff] }
   0x8   :  { %v78_v2 = vld [vmem:[%s819_s23] sm:$0xff]  ;;  %v80_v3 = vld [vmem:[%s819_s23 + $0x10] sm:$0xff]  ;;  %v79_v4 = vld [vmem:[%s819_s23 + $0x8] sm:$0xff]  ;;  %v76_v54 = vsel %vm64_vm6, %v58_v40, %v70_v48  ;;  %312 = vmatpush.bf16.msrb.mxu2 %v553_v17 }
   0x9   :  { %121 = vperm.xlu1 %560, %v78_v2   ;;  %86 = vperm.xlu0 %559, %v78_v2   ;;  %v81_v5 = vld [vmem:[%s819_s23 + $0x18] sm:$0xff]  ;;  %v82_v6 = vld [vmem:[%s819_s23 + $0x20] sm:$0xff]  ;;  %v83_v7 = vld [vmem:[%s819_s23 + $0x28] sm:$0xff] }
   0xa   :  { %96 = vperm.xlu2 %561, %v80_v3  }
  0x11   :  { %125 = vperm.xlu1 %560, %v79_v4   ;;  %91 = vperm.xlu0 %559, %v79_v4  }
  0x12   :  { %101 = vperm.xlu2 %561, %v81_v5  }
  0x19   :  { %133 = vperm.xlu1 %560, %v81_v5   ;;  %562 = vset.pattern.permute.xlu0 %v573_v0  ;;  %v237_v5 = vld [vmem:[%s807_s6] sm:$0xf] }
  0x1a   :  { %129 = vperm.xlu0 %562, %v80_v3   ;;  %106 = vperm.xlu2 %561, %v82_v6  }
  0x21   :  { %563 = vset.pattern.permute.xlu1 %v574_v1 }
  0x22   :  { %111 = vperm.xlu1 %563, %v83_v7   ;;  %141 = vperm.xlu0 %562, %v83_v7  }
  0x23   :  { %564 = vset.pattern.permute.xlu2 %v573_v0 }
  0x24   :  { %137 = vperm.xlu2 %564, %v82_v6   ;;  %v252_v6 = vsel %vm188_vm0, %v237_v5, 0 }
  0x25   :  { %261 = vmatpush.bf16.msra.mxu1 %v252_v6  ;;  %556 = vmatpush.bf16.msra.mxu3 %v252_v6 }
  0x64   :  { %v97_v12 = vpop.permute.xlu2 %96 }
  0x65   :  { %v116_v39 = vsub.f32 %v74_v34, %v97_v12 }
  0x6c   :  { %v102_v22 = vpop.permute.xlu2 %101 }
  0x6d   :  { %v117_v36 = vsub.f32 %v75_v33, %v102_v22 }
  0x74   :  { %v107_v43 = vpop.permute.xlu2 %106 }
  0x75   :  { %v118_v58 = vsub.f32 %v76_v54, %v107_v43 }
  0x7b   :  { %v122_v14 = vpop.permute.xlu1 %121  ;;  %v87_v15 = vpop.permute.xlu0 %86 }
  0x7c   :  { %v114_v18 = vsub.f32 %v72_v16, %v87_v15 }
  0x7e   :  { %v144_v24 = vmul.f32 %v122_v14, %v114_v18  ;;  %v138_v60 = vpop.permute.xlu2 %137 }
  0x7f   :  { %v148_v63 = vmul.f32 %v138_v60, %v118_v58 }
  0x80   :  { %v154_v30 = vmul.f32 %v565_v23, %v144_v24 }
  0x81   :  { %v158_v1 = vmul.f32 %v565_v23, %v148_v63 }
  0x82   :  { %v164_v37 = vadd.f32 %v566_v32, %v154_v30 }
  0x83   :  { %v126_v26 = vpop.permute.xlu1 %125  ;;  %v92_v27 = vpop.permute.xlu0 %91  ;;  %v168_v3 = vadd.f32 %v566_v32, %v158_v1 }
  0x84   :  { %v115_v29 = vsub.f32 %v73_v21, %v92_v27 }
  0x86   :  { %v145_v31 = vmul.f32 %v126_v26, %v115_v29 }
  0x88   :  { %v155_v35 = vmul.f32 %v565_v23, %v145_v31 }
  0x8a   :  { %v165_v38 = vadd.f32 %v566_v32, %v155_v35 }
  0x8b   :  { %v134_v41 = vpop.permute.xlu1 %133 }
  0x8c   :  { %v147_v44 = vmul.f32 %v134_v41, %v117_v36  ;;  %v130_v45 = vpop.permute.xlu0 %129  ;;  %v170_v46 = vpack.c.bf16 %v165_v38, %v164_v37  ;;  %v568_v37 = vld [vmem:[%s806_s7] ss:$0 sm:$0xff] }
  0x8d   :  { %v146_v47 = vmul.f32 %v130_v45, %v116_v39 }
  0x8e   :  { %v157_v49 = vmul.f32 %v565_v23, %v147_v44  ;;  %527 = vmatmul.msk.bf16.vlgmr.msra.gmra.mxu0 %vm178_vm5, %v170_v46  ;;  %v348_v44 = vld [vmem:[%s810_s10] sm:$0xf] }
  0x8f   :  { %v156_v51 = vmul.f32 %v565_v23, %v146_v47  ;;  %v363_v46 = vsel %vm188_vm0, %v348_v44, 0 }
  0x90   :  { %v167_v52 = vadd.f32 %v566_v32, %v157_v49  ;;  %372 = vmatpush.bf16.msrb.mxu3 %v363_v46 }
  0x91   :  { %v166_v53 = vadd.f32 %v566_v32, %v156_v51 }
  0x93   :  { %v171_v56 = vpack.c.bf16 %v167_v52, %v166_v53 }
  0x94   :  { %v112_v57 = vpop.permute.xlu1 %111  ;;  %v142_v61 = vpop.permute.xlu0 %141 }
  0x95   :  { %v119_v59 = vsub.f32 %v77_v55, %v112_v57  ;;  %528 = vmatmul.msk.bf16.vlgmr.msra.gmra.mxu2 %vm178_vm5, %v171_v56 }
  0x97   :  { %v149_v62 = vmul.f32 %v142_v61, %v119_v59 }
  0x99   :  { %v159_v0 = vmul.f32 %v565_v23, %v149_v62  ;;  %v569_v62 = vld [vmem:[%s809_s9] ss:$0 sm:$0xff] }
  0x9b   :  { %v169_v2 = vadd.f32 %v566_v32, %v159_v0 }
  0x9d   :  { %v172_v4 = vpack.c.bf16 %v169_v2, %v168_v3 }
  0xa5   :  { %529 = vmatmul.msk.bf16.gmra.mxu2 %vm178_vm5, %v172_v4 }
 0x10b   :  { %v201_v7 = vpop.f32.mrf.mxu0 }
 0x10c   :  { %v202_v9 = vadd.f32 %v567_v8, %v201_v7 }
 0x10e   :  { %v222_v11 = vmul.f32 0.25, %v202_v9  ;;  %vm216_vm8 = vcmp.gt.f32.partialorder %v202_v9, 0.0 }
 0x110   :  { %v228_v15 = vsel %vm216_vm8, %v202_v9, %v222_v11 }
 0x113   :  { %v203_v10 = vpop.f32.mrf.mxu0 }
 0x114   :  { %v204_v12 = vadd.f32 %v567_v8, %v203_v10 }
 0x116   :  { %vm217_vm9 = vcmp.gt.f32.partialorder %v204_v12, 0.0  ;;  %v223_v13 = vmul.f32 0.25, %v204_v12 }
 0x118   :  { %v206_v14 = vpop.f32.mrf.mxu2  ;;  %v716_v16 = vsel %vm217_vm9, %v204_v12, %v223_v13 }
 0x119   :  { %v234_v18 = vpack.c.bf16 %v716_v16, %v228_v15  ;;  %v207_v19 = vadd.f32 %v567_v8, %v206_v14 }
 0x11b   :  { %530 = vmatmul.msk.bf16.vlgmr.msra.gmra.mxu1 %vm178_vm5, %v234_v18  ;;  %v224_v21 = vmul.f32 0.25, %v207_v19  ;;  %vm218_vm10 = vcmp.gt.f32.partialorder %v207_v19, 0.0  ;;  %v554_v18 = vld [vmem:[%s813_s12] sm:$0xff] }
 0x11c   :  { %422 = vmatpush.bf16.msrb.mxu0 %v554_v18 }
 0x11d   :  { %v230_v24 = vsel %vm218_vm10, %v207_v19, %v224_v21 }
 0x120   :  { %v208_v20 = vpop.f32.mrf.mxu2 }
 0x121   :  { %v209_v22 = vadd.f32 %v567_v8, %v208_v20  ;;  %v570_v20 = vld [vmem:[%s811_s11] ss:$0 sm:$0xff] }
 0x123   :  { %vm219_vm11 = vcmp.gt.f32.partialorder %v209_v22, 0.0  ;;  %v225_v23 = vmul.f32 0.25, %v209_v22 }
 0x125   :  { %v231_v25 = vsel %vm219_vm11, %v209_v22, %v225_v23 }
 0x126   :  { %v235_v26 = vpack.c.bf16 %v231_v25, %v230_v24 }
 0x128   :  { %v211_v27 = vpop.f32.mrf.mxu2  ;;  %531 = vmatmul.msk.bf16.vlgmr.msra.gmra.mxu3 %vm178_vm5, %v235_v26 }
 0x129   :  { %v212_v28 = vadd.f32 %v567_v8, %v211_v27 }
 0x12b   :  { %v226_v30 = vmul.f32 0.25, %v212_v28  ;;  %vm220_vm12 = vcmp.gt.f32.partialorder %v212_v28, 0.0 }
 0x12d   :  { %v232_v33 = vsel %vm220_vm12, %v212_v28, %v226_v30 }
 0x130   :  { %v213_v29 = vpop.f32.mrf.mxu2 }
 0x131   :  { %v214_v31 = vadd.f32 %v567_v8, %v213_v29 }
 0x133   :  { %vm221_vm13 = vcmp.gt.f32.partialorder %v214_v31, 0.0  ;;  %v227_v32 = vmul.f32 0.25, %v214_v31 }
 0x135   :  { %v233_v34 = vsel %vm221_vm13, %v214_v31, %v227_v32 }
 0x136   :  { %v236_v35 = vpack.c.bf16 %v233_v34, %v232_v33 }
 0x138   :  { %532 = vmatmul.msk.bf16.gmra.mxu3 %vm178_vm5, %v236_v35 }
 0x198   :  { %v263_v36 = vpop.f32.mrf.mxu1 }
 0x199   :  { %v264_v38 = vadd.f32 %v568_v37, %v263_v36 }
 0x19b   :  { %v278_v41 = vmax.f32 %v264_v38, 0.0 }
 0x1a0   :  { %v265_v39 = vpop.f32.mrf.mxu1 }
 0x1a1   :  { %v266_v40 = vadd.f32 %v568_v37, %v265_v39 }
 0x1a3   :  { %v279_v42 = vmax.f32 %v266_v40, 0.0 }
 0x1a5   :  { %v284_v43 = vpack.c.bf16 %v279_v42, %v278_v41  ;;  %v476_v41 = vld [vmem:[%s815_s14] sm:$0xf] }
 0x1a6   :  { %v491_v42 = vsel %vm188_vm0, %v476_v41, 0 }
 0x1a7   :  { %537 = vmatmul.msk.bf16.vlgmr.msrb.gmra.mxu2 %vm295_vm14, %v284_v43  ;;  %500 = vmatpush.bf16.msrb.mxu1 %v491_v42 }
 0x1ab   :  { %v268_v45 = vpop.f32.mrf.mxu3 }
 0x1ac   :  { %v269_v47 = vadd.f32 %v568_v37, %v268_v45  ;;  %v571_v45 = vld [vmem:[%s812_s13] ss:$0 sm:$0xff] }
 0x1ae   :  { %v280_v50 = vmax.f32 %v269_v47, 0.0 }
 0x1b3   :  { %v270_v48 = vpop.f32.mrf.mxu3 }
 0x1b4   :  { %v271_v49 = vadd.f32 %v568_v37, %v270_v48 }
 0x1b6   :  { %v281_v51 = vmax.f32 %v271_v49, 0.0 }
 0x1b8   :  { %v285_v52 = vpack.c.bf16 %v281_v51, %v280_v50 }
 0x1ba   :  { %538 = vmatmul.msk.bf16.gmra.mxu2 %vm295_vm14, %v285_v52 }
 0x1bb   :  { %v273_v53 = vpop.f32.mrf.mxu3 }
 0x1bc   :  { %v274_v54 = vadd.f32 %v568_v37, %v273_v53 }
 0x1be   :  { %v282_v57 = vmax.f32 %v274_v54, 0.0 }
 0x1c3   :  { %v275_v55 = vpop.f32.mrf.mxu3 }
 0x1c4   :  { %v276_v56 = vadd.f32 %v568_v37, %v275_v55 }
 0x1c6   :  { %v283_v58 = vmax.f32 %v276_v56, 0.0 }
 0x1c8   :  { %v286_v59 = vpack.c.bf16 %v283_v58, %v282_v57 }
 0x1ca   :  { %539 = vmatmul.msk.bf16.gmra.mxu2 %vm295_vm14, %v286_v59 }
 0x22a   :  { %v314_v60 = vpop.f32.mrf.mxu2 }
 0x22b   :  { %v329_v61 = vadd.f32 %v314_v60, %v228_v15 }
 0x22d   :  { %v339_v1 = vadd.f32 %v569_v62, %v329_v61 }
 0x232   :  { %v316_v63 = vpop.f32.mrf.mxu2 }
 0x233   :  { %v330_v0 = vadd.f32 %v316_v63, %v716_v16 }
 0x235   :  { %v340_v2 = vadd.f32 %v569_v62, %v330_v0 }
 0x237   :  { %v345_v3 = vpack.c.bf16 %v340_v2, %v339_v1 }
 0x239   :  { %540 = vmatmul.msk.bf16.vlgmr.msrb.gmra.mxu3 %vm178_vm5, %v345_v3 }
 0x23d   :  { %v319_v4 = vpop.f32.mrf.mxu2 }
 0x23e   :  { %v331_v5 = vadd.f32 %v319_v4, %v230_v24 }
 0x240   :  { %v341_v8 = vadd.f32 %v569_v62, %v331_v5 }
 0x245   :  { %v321_v6 = vpop.f32.mrf.mxu2 }
 0x246   :  { %v332_v7 = vadd.f32 %v321_v6, %v231_v25 }
 0x248   :  { %v740_v9 = vadd.f32 %v569_v62, %v332_v7 }
 0x24a   :  { %v346_v10 = vpack.c.bf16 %v740_v9, %v341_v8 }
 0x24c   :  { %541 = vmatmul.msk.bf16.gmra.mxu3 %vm178_vm5, %v346_v10 }
 0x24d   :  { %v324_v11 = vpop.f32.mrf.mxu2 }
 0x24e   :  { %v333_v12 = vadd.f32 %v324_v11, %v232_v33 }
 0x250   :  { %v744_v15 = vadd.f32 %v569_v62, %v333_v12 }
 0x255   :  { %v326_v13 = vpop.f32.mrf.mxu2 }
 0x256   :  { %v334_v14 = vadd.f32 %v326_v13, %v233_v34  ;;  %v572_v13 = vld [vmem:[%s814_s15] ss:$0 sm:$0xff] }
 0x258   :  { %v746_v16 = vadd.f32 %v569_v62, %v334_v14 }
 0x25a   :  { %v347_v17 = vpack.c.bf16 %v746_v16, %v744_v15 }
 0x25c   :  { %542 = vmatmul.msk.bf16.gmra.mxu3 %vm178_vm5, %v347_v17 }
 0x2bc   :  { %v374_v19 = vpop.f32.mrf.mxu3 }
 0x2bd   :  { %v375_v21 = vadd.f32 %v570_v20, %v374_v19 }
 0x2bf   :  { %v389_v24 = vmax.f32 %v375_v21, 0.0 }
 0x2c4   :  { %v376_v22 = vpop.f32.mrf.mxu3 }
 0x2c5   :  { %v377_v23 = vadd.f32 %v570_v20, %v376_v22 }
 0x2c7   :  { %v390_v25 = vmax.f32 %v377_v23, 0.0 }
 0x2c9   :  { %v395_v26 = vpack.c.bf16 %v390_v25, %v389_v24 }
 0x2cb   :  { %547 = vmatmul.msk.bf16.vlgmr.msrb.gmra.mxu0 %vm295_vm14, %v395_v26 }
 0x2cf   :  { %v379_v27 = vpop.f32.mrf.mxu3 }
 0x2d0   :  { %v380_v28 = vadd.f32 %v570_v20, %v379_v27 }
 0x2d2   :  { %v391_v31 = vmax.f32 %v380_v28, 0.0 }
 0x2d7   :  { %v381_v29 = vpop.f32.mrf.mxu3 }
 0x2d8   :  { %v382_v30 = vadd.f32 %v570_v20, %v381_v29 }
 0x2da   :  { %v392_v32 = vmax.f32 %v382_v30, 0.0 }
 0x2dc   :  { %v396_v33 = vpack.c.bf16 %v392_v32, %v391_v31 }
 0x2de   :  { %548 = vmatmul.msk.bf16.gmra.mxu0 %vm295_vm14, %v396_v33 }
 0x2df   :  { %v384_v34 = vpop.f32.mrf.mxu3 }
 0x2e0   :  { %v385_v35 = vadd.f32 %v570_v20, %v384_v34 }
 0x2e2   :  { %v393_v38 = vmax.f32 %v385_v35, 0.0 }
 0x2e7   :  { %v386_v36 = vpop.f32.mrf.mxu3 }
 0x2e8   :  { %v387_v37 = vadd.f32 %v570_v20, %v386_v36 }
 0x2ea   :  { %v394_v39 = vmax.f32 %v387_v37, 0.0 }
 0x2ec   :  { %v397_v40 = vpack.c.bf16 %v394_v39, %v393_v38 }
 0x2ee   :  { %549 = vmatmul.msk.bf16.gmra.mxu0 %vm295_vm14, %v397_v40 }
 0x348   :  { %v424_v43 = vpop.f32.mrf.mxu0 }
 0x349   :  { %v439_v44 = vadd.f32 %v424_v43, %v339_v1 }
 0x34b   :  { %v449_v46 = vadd.f32 %v571_v45, %v439_v44 }
 0x34d   :  { %v461_v49 = vmul.f32 0.25, %v449_v46  ;;  %vm455_vm15 = vcmp.gt.f32.partialorder %v449_v46, 0.0 }
 0x34f   :  { %v467_v52 = vsel %vm455_vm15, %v449_v46, %v461_v49 }
 0x350   :  { %v426_v47 = vpop.f32.mrf.mxu0 }
 0x351   :  { %v440_v48 = vadd.f32 %v426_v47, %v340_v2 }
 0x353   :  { %v450_v50 = vadd.f32 %v571_v45, %v440_v48 }
 0x355   :  { %vm456_vm1 = vcmp.gt.f32.partialorder %v450_v50, 0.0  ;;  %v462_v51 = vmul.f32 0.25, %v450_v50 }
 0x357   :  { %v468_v53 = vsel %vm456_vm1, %v450_v50, %v462_v51 }
 0x358   :  { %v473_v54 = vpack.c.bf16 %v468_v53, %v467_v52 }
 0x35a   :  { %550 = vmatmul.msk.bf16.vlgmr.msrb.gmra.mxu1 %vm178_vm5, %v473_v54 }
 0x35b   :  { %v429_v55 = vpop.f32.mrf.mxu0 }
 0x35c   :  { %v441_v56 = vadd.f32 %v429_v55, %v341_v8 }
 0x35e   :  { %v451_v57 = vadd.f32 %v571_v45, %v441_v56 }
 0x360   :  { %v463_v60 = vmul.f32 0.25, %v451_v57  ;;  %vm457_vm0 = vcmp.gt.f32.partialorder %v451_v57, 0.0 }
 0x362   :  { %v469_v63 = vsel %vm457_vm0, %v451_v57, %v463_v60 }
 0x363   :  { %v431_v58 = vpop.f32.mrf.mxu0 }
 0x364   :  { %v442_v59 = vadd.f32 %v431_v58, %v740_v9 }
 0x366   :  { %v452_v61 = vadd.f32 %v571_v45, %v442_v59 }
 0x368   :  { %vm458_vm2 = vcmp.gt.f32.partialorder %v452_v61, 0.0  ;;  %v464_v62 = vmul.f32 0.25, %v452_v61 }
 0x36a   :  { %v470_v0 = vsel %vm458_vm2, %v452_v61, %v464_v62 }
 0x36b   :  { %v434_v1 = vpop.f32.mrf.mxu0  ;;  %v474_v2 = vpack.c.bf16 %v470_v0, %v469_v63 }
 0x36c   :  { %v443_v3 = vadd.f32 %v434_v1, %v744_v15 }
 0x36d   :  { %551 = vmatmul.msk.bf16.gmra.mxu1 %vm178_vm5, %v474_v2 }
 0x36e   :  { %v453_v4 = vadd.f32 %v571_v45, %v443_v3 }
 0x370   :  { %v465_v7 = vmul.f32 0.25, %v453_v4  ;;  %vm459_vm3 = vcmp.gt.f32.partialorder %v453_v4, 0.0 }
 0x372   :  { %v471_v10 = vsel %vm459_vm3, %v453_v4, %v465_v7 }
 0x373   :  { %v436_v5 = vpop.f32.mrf.mxu0 }
 0x374   :  { %v444_v6 = vadd.f32 %v436_v5, %v746_v16 }
 0x376   :  { %v454_v8 = vadd.f32 %v571_v45, %v444_v6 }
 0x378   :  { %vm460_vm4 = vcmp.gt.f32.partialorder %v454_v8, 0.0  ;;  %v466_v9 = vmul.f32 0.25, %v454_v8 }
 0x37a   :  { %v472_v11 = vsel %vm460_vm4, %v454_v8, %v466_v9 }
 0x37b   :  { %v475_v12 = vpack.c.bf16 %v472_v11, %v471_v10 }
 0x37d   :  { %552 = vmatmul.msk.bf16.gmra.mxu1 %vm178_vm5, %v475_v12 }
 0x3d7   :  { %v502_v14 = vpop.f32.mrf.mxu1 }
 0x3d8   :  { %v503_v15 = vadd.f32 %v572_v13, %v502_v14 }
 0x3da   :  { %517 = vst.msk [vmem:[%s816_s16] sm:$0xff] %vm178_vm5, %v503_v15 }
 0x3df   :  { %v504_v16 = vpop.f32.mrf.mxu1 }
 0x3e0   :  { %v505_v17 = vadd.f32 %v572_v13, %v504_v16 }
 0x3e2   :  { %518 = vst.msk [vmem:[%s816_s16 + $0x8] sm:$0xff] %vm178_vm5, %v505_v17 }
 0x3ea   :  { %v507_v18 = vpop.f32.mrf.mxu1 }
 0x3eb   :  { %v508_v19 = vadd.f32 %v572_v13, %v507_v18 }
 0x3ed   :  { %519 = vst.msk [vmem:[%s816_s16 + $0x10] sm:$0xff] %vm178_vm5, %v508_v19 }
 0x3f2   :  { %v509_v20 = vpop.f32.mrf.mxu1 }
 0x3f3   :  { %v510_v21 = vadd.f32 %v572_v13, %v509_v20 }
 0x3f5   :  { %520 = vst.msk [vmem:[%s816_s16 + $0x18] sm:$0xff] %vm178_vm5, %v510_v21 }
 0x3fa   :  { %v512_v22 = vpop.f32.mrf.mxu1 }
 0x3fb   :  { %v513_v23 = vadd.f32 %v572_v13, %v512_v22 }
 0x3fd   :  { %521 = vst.msk [vmem:[%s816_s16 + $0x20] sm:$0xff] %vm178_vm5, %v513_v23 }
 0x402   :  { %v514_v24 = vpop.f32.mrf.mxu1 }
 0x403   :  { %v515_v25 = vadd.f32 %v572_v13, %v514_v24 }
 0x405   :  { %522 = vst.msk [vmem:[%s816_s16 + $0x28] sm:$0xff] %vm178_vm5, %v515_v25 }

// kernel: _lambda_.5
= control target key start
LH: loop header
LB: loop body
LE: loop exit
PB: predicated region body
PF: predicated region fallthrough
CT: control target
= control target key end

     0   :  { %vm54_vm0 = vcmask 1043456   ;;  %vm47_vm5 = vcmask 64512   ;;  %s470_s9 = smov 8   ;;  %s691_s1 = inlined_call_operand.vmem [shape: bf16[8,16], index: 1, kind: input, shape index: {}]   ;;  %s692_s0 = inlined_call_operand.vmem [shape: f32[32,8], index: 0, kind: input, shape index: {}]   ;;  %s693_s2 = inlined_call_operand.vmem [shape: f32[1,16], index: 2, kind: input, shape index: {}]   ;;  %s694_s5 = inlined_call_operand.vmem [shape: f32[1,8], index: 5, kind: input, shape index: {}, may-alias: {4,5}]   ;;  %s695_s3 = inlined_call_operand.vmem [shape: bf16[8,16], index: 3, kind: input, shape index: {}]   ;;  %s696_s4 = inlined_call_operand.vmem [shape: f32[1,8], index: 4, kind: input, shape index: {}, may-alias: {4,5}]   ;;  %s697_s6 = inlined_call_operand.vmem [shape: f32[32,16], index: 6, kind: output, shape index: {}]  }
   0x1   :  { %v42_v0 = vld [vmem:[%s691_s1] sm:$0xf]  ;;  %v25_v2 = vld [vmem:[%s692_s0 + $0x8] sm:$0xff]  ;;  %v26_v5 = vld [vmem:[%s692_s0 + $0x10] sm:$0xff] }
   0x2   :  { %v24_v1 = vld [vmem:[%s692_s0] sm:$0xff]  ;;  %v56_v3 = vsel %vm54_vm0, %v42_v0, 0  ;;  %vm29_vm2 = vcmp.gt.f32.partialorder %v25_v2, 0.0  ;;  %v27_v6 = vld [vmem:[%s692_s0 + $0x18] sm:$0xff]  ;;  %v33_v7 = vmul.f32 0.25, %v25_v2  ;;  %vm30_vm3 = vcmp.gt.f32.partialorder %v26_v5, 0.0 }
   0x3   :  { %vm28_vm1 = vcmp.gt.f32.partialorder %v24_v1, 0.0  ;;  %v32_v4 = vmul.f32 0.25, %v24_v1  ;;  %65 = vmatpush.bf16.msra.mxu0 %v56_v3  ;;  %416 = vmatpush.bf16.msra.mxu3 %v56_v3  ;;  %vm31_vm4 = vcmp.gt.f32.partialorder %v27_v6, 0.0  ;;  %v34_v8 = vmul.f32 0.25, %v26_v5  ;;  %v79_v16 = vld [vmem:[%s695_s3] sm:$0xf] }
   0x4   :  { %v35_v10 = vmul.f32 0.25, %v27_v6  ;;  %v37_v11 = vsel %vm29_vm2, %v25_v2, %v33_v7  ;;  %v87_v17 = vsel %vm54_vm0, %v79_v16, 0  ;;  %v420_v18 = vld [vmem:[%s694_s5] ss:$0 sm:$0xff]  ;;  %s471_s3 = smov 120  }
   0x5   :  { %v36_v9 = vsel %vm28_vm1, %v24_v1, %v32_v4  ;;  %v38_v12 = vsel %vm30_vm3, %v26_v5, %v34_v8  ;;  %96 = vmatpush.bf16.msra.mxu1 %v87_v17  ;;  %249 = vmatpush.bf16.msra.mxu2 %v87_v17  ;;  %v419_v20 = vld [vmem:[%s693_s2] ss:$0 sm:$0xff] }
   0x6   :  { %v40_v13 = vpack.c.bf16 %v37_v11, %v36_v9  ;;  %v39_v14 = vsel %vm31_vm4, %v27_v6, %v35_v10  ;;  %123 = vrot.lane.b32.xlu1 %v420_v18, %s470_s9 }
   0x7   :  { %v41_v15 = vpack.c.bf16 %v39_v14, %v38_v12 }
   0x8   :  { %402 = vmatmul.msk.bf16.vlgmr.msra.gmra.mxu0 %vm47_vm5, %v40_v13 }
   0x9   :  { %403 = vmatmul.msk.bf16.vlgmr.msra.gmra.mxu3 %vm47_vm5, %v41_v15 }
  0x78   :  { %v124_v35 = vpop.permute.xlu1 %123 }
  0x85   :  { %v67_v19 = vpop.f32.mrf.mxu0 }
  0x86   :  { %v68_v23 = vadd.f32 %v419_v20, %v67_v19 }
  0x8c   :  { %v72_v21 = vpop.f32.mrf.mxu3 }
  0x8d   :  { %v69_v22 = vpop.f32.mrf.mxu0  ;;  %v73_v26 = vadd.f32 %v419_v20, %v72_v21 }
  0x8e   :  { %v70_v24 = vadd.f32 %v419_v20, %v69_v22 }
  0x90   :  { %v77_v25 = vpack.c.bf16 %v70_v24, %v68_v23 }
  0x92   :  { %232 = vrot.lane.b32.xlu0 %v77_v25, %s471_s3  ;;  %404 = vmatmul.msk.bf16.vlgmr.msra.gmra.mxu1 %vm47_vm5, %v77_v25 }
  0x94   :  { %v74_v27 = vpop.f32.mrf.mxu3 }
  0x95   :  { %v75_v28 = vadd.f32 %v419_v20, %v74_v27 }
  0x97   :  { %v78_v29 = vpack.c.bf16 %v75_v28, %v73_v26 }
  0x9a   :  { %234 = vrot.lane.b32.xlu0 %v78_v29, %s471_s3 }
  0xa2   :  { %405 = vmatmul.msk.bf16.gmra.mxu1 %vm47_vm5, %v78_v29 }
 0x104   :  { %v233_v30 = vpop.permute.xlu0 %232 }
 0x105   :  { %410 = vmatmul.msk.bf16.vlgmr.msra.gmra.mxu2 %vm47_vm5, %v233_v30 }
 0x10c   :  { %v235_v31 = vpop.permute.xlu0 %234 }
 0x10f   :  { %v542_v32 = vpop.f32.mrf.mxu1 }
 0x110   :  { %v126_v36 = vadd.f32 %v124_v35, %v542_v32 }
 0x112   :  { %v406_v37 = vmul.f32 -1.442695, %v126_v36 }
 0x114   :  { %422 = vpow2.f32 %v406_v37 }
 0x115   :  { %411 = vmatmul.msk.bf16.gmra.mxu2 %vm47_vm5, %v235_v31 }
 0x117   :  { %v544_v33 = vpop.f32.mrf.mxu1 }
 0x118   :  { %v127_v44 = vadd.f32 %v124_v35, %v544_v33 }
 0x11a   :  { %v423_v43 = vpop.eup %422  ;;  %v407_v47 = vmul.f32 -1.442695, %v127_v44 }
 0x11b   :  { %v556_v46 = vadd.f32 1.0, %v423_v43 }
 0x11d   :  { %vm151_vm11 = vweird.f32 %v556_v46  ;;  %v157_v30 = vand.u32 2147483648, %v556_v46  ;;  %v155_v36 = vand.u32 2147483647, %v556_v46 }
 0x11f   :  { %v546_v34 = vpop.f32.mrf.mxu1  ;;  %vm156_vm1 = vcmp.eq.f32.partialorder %v155_v36, 8.507059e+37 }
 0x120   :  { %v128_v53 = vadd.f32 %v124_v35, %v546_v34 }
 0x122   :  { %v408_v57 = vmul.f32 -1.442695, %v128_v53 }
 0x127   :  { %v549_v38 = vpop.f32.mrf.mxu1 }
 0x128   :  { %v129_v39 = vadd.f32 %v124_v35, %v549_v38 }
 0x12a   :  { %v409_v40 = vmul.f32 -1.442695, %v129_v39 }
 0x12c   :  { %424 = vpow2.f32 %v409_v40 }
 0x132   :  { %v425_v50 = vpop.eup %424 }
 0x133   :  { %v563_v55 = vadd.f32 1.0, %v425_v50 }
 0x135   :  { %vm196_vm3 = vweird.f32 %v563_v55 }
 0x188   :  { %v552_v41 = vpop.f32.mrf.mxu2 }
 0x189   :  { %v269_v42 = vadd.f32 %v552_v41, %v124_v35 }
 0x18b   :  { %v412_v45 = vmul.f32 -1.442695, %v269_v42 }
 0x18d   :  { %426 = vpow2.f32 %v412_v45 }
 0x18e   :  { %428 = vrcp.f32 %v556_v46 }
 0x18f   :  { %430 = vpow2.f32 %v407_v47 }
 0x190   :  { %v558_v48 = vpop.f32.mrf.mxu2 }
 0x191   :  { %v270_v49 = vadd.f32 %v558_v48, %v124_v35 }
 0x193   :  { %v427_v51 = vpop.eup %426  ;;  %v413_v52 = vmul.f32 -1.442695, %v270_v49  ;;  %v158_v49 = vor.u32 1.1754944e-38, %v157_v30 }
 0x194   :  { %v285_v54 = vadd.f32 1.0, %v427_v51  ;;  %v565_v56 = vpop.eup %428 }
 0x195   :  { %432 = vpow2.f32 %v413_v52  ;;  %v431_v59 = vpop.eup %430  ;;  %v147_v61 = vmul.f32 %v565_v56, %v556_v46  ;;  %vm152_vm10 = vweird.f32 %v565_v56 }
 0x196   :  { %434 = vrcp.f32 %v285_v54  ;;  %v573_v1 = vadd.f32 1.0, %v431_v59  ;;  %v300_v8 = vand.u32 2147483648, %v285_v54  ;;  %v298_v11 = vand.u32 2147483647, %v285_v54  ;;  %vm598_vm13 = vmor %vm151_vm11, %vm152_vm10 }
 0x197   :  { %436 = vrcp.f32 %v563_v55  ;;  %v148_v4 = vsub.f32 1.0, %v147_v61  ;;  %vm294_vm7 = vweird.f32 %v285_v54  ;;  %v202_v61 = vand.u32 2147483648, %v563_v55 }
 0x198   :  { %v567_v58 = vpop.f32.mrf.mxu2  ;;  %438 = vpow2.f32 %v408_v57  ;;  %v301_v20 = vor.u32 1.1754944e-38, %v300_v8  ;;  %vm299_vm9 = vcmp.eq.f32.partialorder %v298_v11, 8.507059e+37 }
 0x199   :  { %v271_v60 = vadd.f32 %v567_v58, %v124_v35  ;;  %v149_v13 = vmul.f32 %v565_v56, %v148_v4 }
 0x19b   :  { %v433_v62 = vpop.eup %432  ;;  %v414_v63 = vmul.f32 -1.442695, %v271_v60  ;;  %v150_v27 = vadd.f32 %v565_v56, %v149_v13 }
 0x19c   :  { %v435_v0 = vpop.eup %434  ;;  %v286_v2 = vadd.f32 1.0, %v433_v62 }
 0x19d   :  { %440 = vpow2.f32 %v414_v63  ;;  %v290_v3 = vmul.f32 %v435_v0, %v285_v54  ;;  %v575_v6 = vpop.eup %436  ;;  %vm295_vm6 = vweird.f32 %v435_v0  ;;  %v154_v43 = vsel %vm598_vm13, %v565_v56, %v150_v27 }
 0x19e   :  { %442 = vrcp.f32 %v286_v2  ;;  %v439_v12 = vpop.eup %438  ;;  %v192_v17 = vmul.f32 %v575_v6, %v563_v55  ;;  %vm296_vm8 = vmor %vm294_vm7, %vm295_vm6  ;;  %v315_v29 = vand.u32 2147483648, %v286_v2  ;;  %vm309_vm14 = vweird.f32 %v286_v2 }
 0x19f   :  { %v291_v5 = vsub.f32 1.0, %v290_v3  ;;  %444 = vrcp.f32 %v573_v1  ;;  %v588_v24 = vadd.f32 1.0, %v439_v12  ;;  %v159_v53 = vsel %vm156_vm1, %v158_v49, %v154_v43 }
 0x1a0   :  { %v578_v7 = vpop.f32.mrf.mxu2  ;;  %v193_v28 = vsub.f32 1.0, %v192_v17  ;;  %v316_v47 = vor.u32 1.1754944e-38, %v315_v29  ;;  %vm197_vm2 = vweird.f32 %v575_v6 }
 0x1a1   :  { %v272_v9 = vadd.f32 %v578_v7, %v124_v35  ;;  %v292_v10 = vmul.f32 %v435_v0, %v291_v5  ;;  %v313_v35 = vand.u32 2147483647, %v286_v2  ;;  %vm623_vm6 = vmor %vm196_vm3, %vm197_vm2 }
 0x1a2   :  { %v194_v44 = vmul.f32 %v575_v6, %v193_v28 }
 0x1a3   :  { %v441_v14 = vpop.eup %440  ;;  %v415_v15 = vmul.f32 -1.442695, %v272_v9  ;;  %v293_v16 = vadd.f32 %v435_v0, %v292_v10  ;;  %vm314_vm0 = vcmp.eq.f32.partialorder %v313_v35, 8.507059e+37  ;;  %v185_v35 = vand.u32 2147483647, %v588_v24 }
 0x1a4   :  { %v443_v18 = vpop.eup %442  ;;  %v584_v19 = vadd.f32 1.0, %v441_v14  ;;  %v195_v57 = vadd.f32 %v575_v6, %v194_v44 }
 0x1a5   :  { %446 = vpow2.f32 %v415_v15  ;;  %v297_v21 = vsel %vm296_vm8, %v435_v0, %v293_v16  ;;  %v305_v22 = vmul.f32 %v443_v18, %v286_v2  ;;  %v586_v23 = vpop.eup %444  ;;  %vm310_vm12 = vweird.f32 %v443_v18 }
 0x1a6   :  { %448 = vrcp.f32 %v584_v19  ;;  %v302_v25 = vsel %vm299_vm9, %v301_v20, %v297_v21  ;;  %v162_v39 = vmul.f32 %v586_v23, %v573_v1  ;;  %vm311_vm15 = vmor %vm309_vm14, %vm310_vm12  ;;  %v330_v60 = vand.u32 2147483648, %v584_v19 }
 0x1a7   :  { %353 = vrot.lane.b32.xlu1 %v302_v25, %s471_s3  ;;  %v306_v26 = vsub.f32 1.0, %v305_v22  ;;  %450 = vrcp.f32 %v588_v24  ;;  %v328_v63 = vand.u32 2147483647, %v584_v19  ;;  %v200_v0 = vand.u32 2147483647, %v563_v55 }
 0x1a8   :  { %v163_v54 = vsub.f32 1.0, %v162_v39  ;;  %vm324_vm7 = vweird.f32 %v584_v19  ;;  %v199_v5 = vsel %vm623_vm6, %v575_v6, %v195_v57  ;;  %v331_v10 = vor.u32 1.1754944e-38, %v330_v60 }
 0x1a9   :  { %v307_v31 = vmul.f32 %v443_v18, %v306_v26  ;;  %v203_v55 = vor.u32 1.1754944e-38, %v202_v61  ;;  %vm329_vm9 = vcmp.eq.f32.partialorder %v328_v63, 8.507059e+37  ;;  %vm201_vm10 = vcmp.eq.f32.partialorder %v200_v0, 8.507059e+37 }
 0x1aa   :  { %v164_v3 = vmul.f32 %v586_v23, %v163_v54  ;;  %vm167_vm11 = vweird.f32 %v586_v23  ;;  %vm166_vm12 = vweird.f32 %v573_v1  ;;  %v170_v21 = vand.u32 2147483647, %v573_v1 }
 0x1ab   :  { %v447_v40 = vpop.eup %446  ;;  %v308_v42 = vadd.f32 %v443_v18, %v307_v31  ;;  %v204_v14 = vsel %vm201_vm10, %v203_v55, %v199_v5  ;;  %vm168_vm14 = vmor %vm166_vm12, %vm167_vm11 }
 0x1ac   :  { %v449_v45 = vpop.eup %448  ;;  %v608_v46 = vadd.f32 1.0, %v447_v40  ;;  %v165_v6 = vadd.f32 %v586_v23, %v164_v3  ;;  %vm171_vm2 = vcmp.eq.f32.partialorder %v170_v21, 8.507059e+37  ;;  %v421_v40 = vld [vmem:[%s696_s4] ss:$0 sm:$0xff] }
 0x1ad   :  { %v312_v50 = vsel %vm311_vm15, %v443_v18, %v308_v42  ;;  %v320_v51 = vmul.f32 %v449_v45, %v584_v19  ;;  %v616_v59 = vpop.eup %450  ;;  %vm325_vm4 = vweird.f32 %v449_v45  ;;  %v172_v18 = vand.u32 2147483648, %v573_v1 }
 0x1ae   :  { %452 = vrcp.f32 %v608_v46  ;;  %v317_v52 = vsel %vm314_vm0, %v316_v47, %v312_v50  ;;  %v177_v8 = vmul.f32 %v616_v59, %v588_v24  ;;  %vm326_vm8 = vmor %vm324_vm7, %vm325_vm4  ;;  %v345_v17 = vand.u32 2147483648, %v608_v46 }
 0x1af   :  { %355 = vrot.lane.b32.xlu2 %v317_v52, %s471_s3  ;;  %210 = vrot.lane.b32.xlu1 %v159_v53, %s471_s3  ;;  %v321_v56 = vsub.f32 1.0, %v320_v51  ;;  %v343_v20 = vand.u32 2147483647, %v608_v46  ;;  %vm339_vm15 = vweird.f32 %v608_v46  ;;  %v169_v25 = vsel %vm168_vm14, %v586_v23, %v165_v6 }
 0x1b0   :  { %v178_v16 = vsub.f32 1.0, %v177_v8  ;;  %v346_v27 = vor.u32 1.1754944e-38, %v345_v17  ;;  %v173_v28 = vor.u32 1.1754944e-38, %v172_v18  ;;  %vm182_vm3 = vweird.f32 %v616_v59 }
 0x1b1   :  { %v322_v62 = vmul.f32 %v449_v45, %v321_v56  ;;  %vm344_vm1 = vcmp.eq.f32.partialorder %v343_v20, 8.507059e+37  ;;  %v187_v23 = vand.u32 2147483648, %v588_v24  ;;  %vm181_vm4 = vweird.f32 %v588_v24 }
 0x1b2   :  { %v179_v26 = vmul.f32 %v616_v59, %v178_v16  ;;  %v174_v31 = vsel %vm171_vm2, %v173_v28, %v169_v25  ;;  %vm183_vm6 = vmor %vm181_vm4, %vm182_vm3  ;;  %vm186_vm7 = vcmp.eq.f32.partialorder %v185_v35, 8.507059e+37  ;;  %v262_v42 = vadd.f32 %v421_v40, %v558_v48 }
 0x1b3   :  { %v323_v4 = vadd.f32 %v449_v45, %v322_v62  ;;  %v188_v37 = vor.u32 1.1754944e-38, %v187_v23  ;;  %v263_v43 = vadd.f32 %v421_v40, %v567_v58  ;;  %v261_v47 = vadd.f32 %v421_v40, %v552_v41 }
 0x1b4   :  { %v453_v9 = vpop.eup %452  ;;  %v180_v1 = vadd.f32 %v616_v59, %v179_v26  ;;  %454 = vtanh.f32 %v262_v42  ;;  %v264_v56 = vadd.f32 %v421_v40, %v578_v7  ;;  %v112_v61 = vadd.f32 %v421_v40, %v542_v32 }
 0x1b5   :  { %v327_v11 = vsel %vm326_vm8, %v449_v45, %v323_v4  ;;  %v335_v12 = vmul.f32 %v453_v9, %v608_v46  ;;  %vm340_vm13 = vweird.f32 %v453_v9  ;;  %456 = vtanh.f32 %v263_v43 }
 0x1b6   :  { %v332_v13 = vsel %vm329_vm9, %v331_v10, %v327_v11  ;;  %vm341_vm0 = vmor %vm339_vm15, %vm340_vm13  ;;  %v184_v36 = vsel %vm183_vm6, %v616_v59, %v180_v1  ;;  %458 = vtanh.f32 %v261_v47  ;;  %v113_v62 = vadd.f32 %v421_v40, %v544_v33 }
 0x1b7   :  { %357 = vrot.lane.b32.xlu2 %v332_v13, %s471_s3  ;;  %216 = vrot.lane.b32.xlu1 %v204_v14, %s471_s3  ;;  %v336_v15 = vsub.f32 1.0, %v335_v12  ;;  %v189_v39 = vsel %vm186_vm7, %v188_v37, %v184_v36  ;;  %460 = vtanh.f32 %v264_v56  ;;  %vm393_vm8 = vcmask 130048  }
 0x1b8   :  { %462 = vtanh.f32 %v112_v61  ;;  %v114_v7 = vadd.f32 %v421_v40, %v546_v34  ;;  %v115_v55 = vadd.f32 %v421_v40, %v549_v38 }
 0x1b9   :  { %v337_v19 = vmul.f32 %v453_v9, %v336_v15  ;;  %464 = vtanh.f32 %v113_v62 }
 0x1ba   :  { %v455_v44 = vpop.eup %454  ;;  %466 = vtanh.f32 %v114_v7 }
 0x1bb   :  { %v338_v22 = vadd.f32 %v453_v9, %v337_v19  ;;  %v457_v49 = vpop.eup %456  ;;  %468 = vtanh.f32 %v115_v55 }
 0x1bc   :  { %v459_v48 = vpop.eup %458 }
 0x1bd   :  { %v342_v29 = vsel %vm341_vm0, %v453_v9, %v338_v22  ;;  %v461_v57 = vpop.eup %460 }
 0x1be   :  { %v347_v30 = vsel %vm344_vm1, %v346_v27, %v342_v29  ;;  %v463_v2 = vpop.eup %462 }
 0x1bf   :  { %359 = vrot.lane.b32.xlu0 %v347_v30, %s471_s3  ;;  %212 = vrot.lane.b32.xlu2 %v174_v31, %s471_s3  ;;  %v465_v10 = vpop.eup %464 }
 0x1c0   :  { %v467_v34 = vpop.eup %466 }
 0x1c1   :  { %v469_v17 = vpop.eup %468 }
 0x1c7   :  { %214 = vrot.lane.b32.xlu0 %v189_v39, %s471_s3 }
 0x209   :  { %v356_v45 = vpop.permute.xlu2 %355 }
 0x20a   :  { %v366_v24 = vmul.f32 %v455_v44, %v356_v45 }
 0x20c   :  { %v370_v46 = vmax.f32 %v366_v24, 0.0 }
 0x20e   :  { %379 = vrot.lane.b32.xlu0 %v370_v46, %s470_s9 }
 0x211   :  { %v358_v50 = vpop.permute.xlu2 %357 }
 0x212   :  { %v367_v51 = vmul.f32 %v457_v49, %v358_v50 }
 0x214   :  { %v371_v52 = vmax.f32 %v367_v51, 0.0 }
 0x216   :  { %381 = vrot.lane.b32.xlu1 %v371_v52, %s470_s9 }
 0x219   :  { %v354_v53 = vpop.permute.xlu1 %353  ;;  %v213_v63 = vpop.permute.xlu2 %212 }
 0x21a   :  { %v365_v54 = vmul.f32 %v459_v48, %v354_v53  ;;  %v223_v32 = vmul.f32 %v465_v10, %v213_v63 }
 0x21c   :  { %v369_v58 = vmax.f32 %v365_v54, 0.0  ;;  %v227_v33 = vmax.f32 %v223_v32, 0.0 }
 0x21e   :  { %377 = vrot.lane.b32.xlu2 %v369_v58, %s470_s9 }
 0x221   :  { %v211_v0 = vpop.permute.xlu1 %210 }
 0x222   :  { %v222_v3 = vmul.f32 %v463_v2, %v211_v0 }
 0x224   :  { %v226_v4 = vmax.f32 %v222_v3, 0.0 }
 0x229   :  { %v217_v11 = vpop.permute.xlu1 %216 }
 0x22a   :  { %v225_v38 = vmul.f32 %v469_v17, %v217_v11 }
 0x22c   :  { %v229_v18 = vmax.f32 %v225_v38, 0.0 }
 0x231   :  { %v360_v59 = vpop.permute.xlu0 %359 }
 0x232   :  { %v368_v60 = vmul.f32 %v461_v57, %v360_v59 }
 0x234   :  { %v372_v41 = vmax.f32 %v368_v60, 0.0 }
 0x236   :  { %383 = vrot.lane.b32.xlu2 %v372_v41, %s470_s9 }
 0x239   :  { %v215_v5 = vpop.permute.xlu0 %214 }
 0x23a   :  { %v224_v14 = vmul.f32 %v467_v34, %v215_v5 }
 0x23c   :  { %v228_v15 = vmax.f32 %v224_v14, 0.0 }
 0x278   :  { %v378_v8 = vpop.permute.xlu2 %377 }
 0x279   :  { %v389_v9 = vsel %vm47_vm5, %v226_v4, %v378_v8 }
 0x27a   :  { %394 = vst.msk [vmem:[%s697_s6] sm:$0xff] %vm393_vm8, %v389_v9 }
 0x280   :  { %v380_v12 = vpop.permute.xlu0 %379 }
 0x281   :  { %v390_v13 = vsel %vm47_vm5, %v227_v33, %v380_v12 }
 0x282   :  { %395 = vst.msk [vmem:[%s697_s6 + $0x8] sm:$0xff] %vm393_vm8, %v390_v13 }
 0x288   :  { %v382_v6 = vpop.permute.xlu1 %381 }
 0x289   :  { %v391_v16 = vsel %vm47_vm5, %v228_v15, %v382_v6 }
 0x28a   :  { %396 = vst.msk [vmem:[%s697_s6 + $0x10] sm:$0xff] %vm393_vm8, %v391_v16 }
 0x290   :  { %v384_v19 = vpop.permute.xlu2 %383 }
 0x291   :  { %v392_v20 = vsel %vm47_vm5, %v229_v18, %v384_v19 }
 0x292   :  { %397 = vst.msk [vmem:[%s697_s6 + $0x18] sm:$0xff] %vm393_vm8, %v392_v20 }

</bundles_post_ra>
